<compile_context>
chip_gen: v5e
topology: v5e:2x2
jax: 0.10.0
libtpu: 0.0.40
codegen_flags: <defaults>
</compile_context>

<pallas_src>
import math
import functools

import jax
import jax.numpy as jnp
from jax import lax
from jax.experimental import pallas as pl
from jax.experimental.pallas import tpu as pltpu


# --------------------------- fused Pallas kernel --------------------------- #
def _spatial_attention_kernel(w_ref, x_ref, o_ref, pad_ref, *, C, H, W, K):
    """One image per grid step.

    w_ref  : SMEM, (2*K*K,) f32, conv weight flattened as (cin, kh, kw).
    x_ref  : VMEM, (C, H, W) f32 input block.
    o_ref  : VMEM, (C, H, W) f32 output block.
    pad_ref: VMEM scratch, (2, H+2p, W+2p) f32 zero-padded pooled maps.
    """
    pad = K // 2

    # ---- 1) channel-wise max & mean, streamed over C (bounded vreg pressure) ----
    def _reduce(c, carry):
        mx, sm = carry
        xc = x_ref[c]                                   # [H, W]
        return jnp.maximum(mx, xc), sm + xc

    x0 = x_ref[0]
    mx, sm = lax.fori_loop(1, C, _reduce, (x0, x0))
    mean = sm * (1.0 / C)

    # ---- 2) zero-padded pooled maps in VMEM scratch ----
    pad_ref[...] = jnp.zeros_like(pad_ref)
    pad_ref[0, pl.ds(pad, H), pl.ds(pad, W)] = mx
    pad_ref[1, pl.ds(pad, H), pl.ds(pad, W)] = mean

    # ---- 3) 7x7, 2-in/1-out conv = 2*K*K scalar-weighted shifted adds (VPU) ----
    acc = jnp.zeros((H, W), jnp.float32)
    for c in range(2):
        for kh in range(K):
            for kw in range(K):
                wgt = w_ref[(c * K + kh) * K + kw]      # scalar from SMEM
                acc = acc + wgt * pad_ref[c, pl.ds(kh, H), pl.ds(kw, W)]

    # ---- 4) sigmoid gate + broadcast multiply (fused epilogue, EUP exp) ----
    gate = 1.0 / (1.0 + jnp.exp(-acc))

    @pl.loop(0, C)
    def _(c):
        o_ref[c] = (x_ref[c] * gate).astype(o_ref.dtype)


# -------------------------------- wrapper ---------------------------------- #
def spatial_attention(x, weight):
    """x: [N, C, H, W] (NCHW);  weight: [1, 2, K, K] (PyTorch Conv2d layout)."""
    N, C, H, W = x.shape
    K = weight.shape[-1]
    pad = K // 2

    x = x.astype(jnp.float32)
    w_flat = weight.astype(jnp.float32).reshape(-1)     # (2*K*K,), (cin, kh, kw) order

    kernel = functools.partial(_spatial_attention_kernel, C=C, H=H, W=W, K=K)
    return pl.pallas_call(
        kernel,
        out_shape=jax.ShapeDtypeStruct((N, C, H, W), jnp.float32),
        grid_spec=pltpu.PrefetchScalarGridSpec(
            num_scalar_prefetch=0,
            grid=(N,),
            in_specs=[
                pl.BlockSpec(memory_space=pltpu.MemorySpace.SMEM),   # conv weights (scalars)
                pl.BlockSpec((None, C, H, W), lambda n: (n, 0, 0, 0)),
            ],
            out_specs=pl.BlockSpec((None, C, H, W), lambda n: (n, 0, 0, 0)),
            scratch_shapes=[pltpu.VMEM((2, H + 2 * pad, W + 2 * pad), jnp.float32)],
        ),
        compiler_params=pltpu.CompilerParams(
            dimension_semantics=("parallel",)),
    )(w_flat, x)


# -------------------------- pure-JAX reference ------------------------------ #
def _reference(x, weight):
    mx = jnp.max(x, axis=1, keepdims=True)
    mn = jnp.mean(x, axis=1, keepdims=True)
    pool = jnp.concatenate([mx, mn], axis=1)
    K = weight.shape[-1]
    p = K // 2
    conv = lax.conv_general_dilated(
        pool, weight, window_strides=(1, 1), padding=[(p, p), (p, p)],
        dimension_numbers=("NCHW", "OIHW", "NCHW"))
    gate = jax.nn.sigmoid(conv)
    return x * gate


# ---------------------------------- main ------------------------------------ #
if __name__ == "__main__":
    key = jax.random.PRNGKey(0)
    kx, kw = jax.random.split(key)

    N, C, H, W, K = 2, 64, 16, 16, 7
    x = jax.random.normal(kx, (N, C, H, W), jnp.float32)
    bound = 1.0 / math.sqrt(2 * K * K)
    weight = jax.random.uniform(kw, (1, 2, K, K), jnp.float32, -bound, bound)

    fwd = jax.jit(spatial_attention)
    out = jax.block_until_ready(fwd(x, weight))
    assert out.shape == (N, C, H, W), out.shape
    assert bool(jnp.all(jnp.isfinite(out)))

    ref = _reference(x, weight)
    assert bool(jnp.allclose(out, ref, atol=1e-4, rtol=1e-4)), float(
        jnp.max(jnp.abs(out - ref)))

    print("KERNEL_OK")
</pallas_src>

<mosaic_0001>
module attributes {stable_mosaic.version = 11 : i64} {
  func.func @_spatial_attention_kernel(%arg0: i32, %arg1: memref<98xf32, #tpu.memory_space<smem>>, %arg2: memref<1x64x16x16xf32, #tpu.memory_space<vmem>>, %arg3: memref<1x64x16x16xf32, #tpu.memory_space<vmem>>, %arg4: memref<2x22x22xf32, #tpu.memory_space<vmem>>) attributes {dimension_semantics = [#tpu.dimension_semantics<parallel>], iteration_bounds = array<i64: 2>, scalar_prefetch = 0 : i64, scratch_operands = 1 : i64, tpu.core_type = #tpu.core_type<tc>, window_params = [{transform_indices = @transform_0, window_bounds = array<i64: 98>}, {transform_indices = @transform_1, window_bounds = array<i64: 1, 64, 16, 16>}, {transform_indices = @transform_2, window_bounds = array<i64: 1, 64, 16, 16>}]} {
    %c0 = arith.constant 0 : index
    %c0_0 = arith.constant 0 : index
    %c0_1 = arith.constant 0 : index
    %c0_2 = arith.constant 0 : index
    %0 = vector.load %arg2[%c0, %c0_0, %c0_1, %c0_2] : memref<1x64x16x16xf32, #tpu.memory_space<vmem>>, vector<1x1x16x16xf32>
    %1 = vector.shape_cast %0 : vector<1x1x16x16xf32> to vector<16x16xf32>
    %c1_i32 = arith.constant 1 : i32
    %c63_i32 = arith.constant 63 : i32
    %2 = arith.addi %c1_i32, %c63_i32 : i32
    %c1_i32_3 = arith.constant 1 : i32
    %3:2 = scf.for %arg5 = %c1_i32 to %2 step %c1_i32_3 iter_args(%arg6 = %1, %arg7 = %1) -> (vector<16x16xf32>, vector<16x16xf32>)  : i32 {
      %c0_316 = arith.constant 0 : index
      %611 = arith.index_cast %arg5 : i32 to index
      %c0_317 = arith.constant 0 : index
      %c0_318 = arith.constant 0 : index
      %612 = vector.load %arg2[%c0_316, %611, %c0_317, %c0_318] : memref<1x64x16x16xf32, #tpu.memory_space<vmem>>, vector<1x1x16x16xf32>
      %613 = vector.shape_cast %612 : vector<1x1x16x16xf32> to vector<16x16xf32>
      %614 = arith.maximumf %arg6, %613 : vector<16x16xf32>
      %615 = arith.addf %arg7, %613 : vector<16x16xf32>
      scf.yield %614, %615 : vector<16x16xf32>, vector<16x16xf32>
    }
    %c63_i32_4 = arith.constant 63 : i32
    %cst = arith.constant 1.562500e-02 : f32
    %4 = vector.broadcast %cst : f32 to vector<16x16xf32>
    %5 = arith.mulf %3#1, %4 : vector<16x16xf32>
    %cst_5 = arith.constant 0.000000e+00 : f32
    %6 = vector.broadcast %cst_5 : f32 to vector<2x22x22xf32>
    %c0_6 = arith.constant 0 : index
    %c0_7 = arith.constant 0 : index
    %c0_8 = arith.constant 0 : index
    %7 = vector.load %arg4[%c0_6, %c0_7, %c0_8] : memref<2x22x22xf32, #tpu.memory_space<vmem>>, vector<2x22x22xf32>
    tpu.vector_store %arg4[%c0_6, %c0_7, %c0_8], %6 {strides = array<i32>} : memref<2x22x22xf32, #tpu.memory_space<vmem>>, vector<2x22x22xf32>,
    %c0_9 = arith.constant 0 : index
    %c3 = arith.constant 3 : index
    %c3_10 = arith.constant 3 : index
    %8 = vector.load %arg4[%c0_9, %c3, %c3_10] : memref<2x22x22xf32, #tpu.memory_space<vmem>>, vector<1x16x16xf32>
    %9 = vector.shape_cast %8 : vector<1x16x16xf32> to vector<16x16xf32>
    %10 = vector.shape_cast %3#0 : vector<16x16xf32> to vector<1x16x16xf32>
    tpu.vector_store %arg4[%c0_9, %c3, %c3_10], %10 {strides = array<i32>} : memref<2x22x22xf32, #tpu.memory_space<vmem>>, vector<1x16x16xf32>,
    %c1 = arith.constant 1 : index
    %c3_11 = arith.constant 3 : index
    %c3_12 = arith.constant 3 : index
    %11 = vector.load %arg4[%c1, %c3_11, %c3_12] : memref<2x22x22xf32, #tpu.memory_space<vmem>>, vector<1x16x16xf32>
    %12 = vector.shape_cast %11 : vector<1x16x16xf32> to vector<16x16xf32>
    %13 = vector.shape_cast %5 : vector<16x16xf32> to vector<1x16x16xf32>
    tpu.vector_store %arg4[%c1, %c3_11, %c3_12], %13 {strides = array<i32>} : memref<2x22x22xf32, #tpu.memory_space<vmem>>, vector<1x16x16xf32>,
    %cst_13 = arith.constant 0.000000e+00 : f32
    %14 = vector.broadcast %cst_13 : f32 to vector<16x16xf32>
    %c0_14 = arith.constant 0 : index
    %15 = memref.load %arg1[%c0_14] : memref<98xf32, #tpu.memory_space<smem>>
    %c0_15 = arith.constant 0 : index
    %c0_16 = arith.constant 0 : index
    %c0_17 = arith.constant 0 : index
    %16 = vector.load %arg4[%c0_15, %c0_16, %c0_17] : memref<2x22x22xf32, #tpu.memory_space<vmem>>, vector<1x16x16xf32>
    %17 = vector.shape_cast %16 : vector<1x16x16xf32> to vector<16x16xf32>
    %18 = vector.broadcast %15 : f32 to vector<16x16xf32>
    %19 = arith.mulf %18, %17 : vector<16x16xf32>
    %20 = arith.addf %14, %19 : vector<16x16xf32>
    %c1_18 = arith.constant 1 : index
    %21 = memref.load %arg1[%c1_18] : memref<98xf32, #tpu.memory_space<smem>>
    %c0_19 = arith.constant 0 : index
    %c0_20 = arith.constant 0 : index
    %c1_21 = arith.constant 1 : index
    %22 = vector.load %arg4[%c0_19, %c0_20, %c1_21] : memref<2x22x22xf32, #tpu.memory_space<vmem>>, vector<1x16x16xf32>
    %23 = vector.shape_cast %22 : vector<1x16x16xf32> to vector<16x16xf32>
    %24 = vector.broadcast %21 : f32 to vector<16x16xf32>
    %25 = arith.mulf %24, %23 : vector<16x16xf32>
    %26 = arith.addf %20, %25 : vector<16x16xf32>
    %c2 = arith.constant 2 : index
    %27 = memref.load %arg1[%c2] : memref<98xf32, #tpu.memory_space<smem>>
    %c0_22 = arith.constant 0 : index
    %c0_23 = arith.constant 0 : index
    %c2_24 = arith.constant 2 : index
    %28 = vector.load %arg4[%c0_22, %c0_23, %c2_24] : memref<2x22x22xf32, #tpu.memory_space<vmem>>, vector<1x16x16xf32>
    %29 = vector.shape_cast %28 : vector<1x16x16xf32> to vector<16x16xf32>
    %30 = vector.broadcast %27 : f32 to vector<16x16xf32>
    %31 = arith.mulf %30, %29 : vector<16x16xf32>
    %32 = arith.addf %26, %31 : vector<16x16xf32>
    %c3_25 = arith.constant 3 : index
    %33 = memref.load %arg1[%c3_25] : memref<98xf32, #tpu.memory_space<smem>>
    %c0_26 = arith.constant 0 : index
    %c0_27 = arith.constant 0 : index
    %c3_28 = arith.constant 3 : index
    %34 = vector.load %arg4[%c0_26, %c0_27, %c3_28] : memref<2x22x22xf32, #tpu.memory_space<vmem>>, vector<1x16x16xf32>
    %35 = vector.shape_cast %34 : vector<1x16x16xf32> to vector<16x16xf32>
    %36 = vector.broadcast %33 : f32 to vector<16x16xf32>
    %37 = arith.mulf %36, %35 : vector<16x16xf32>
    %38 = arith.addf %32, %37 : vector<16x16xf32>
    %c4 = arith.constant 4 : index
    %39 = memref.load %arg1[%c4] : memref<98xf32, #tpu.memory_space<smem>>
    %c0_29 = arith.constant 0 : index
    %c0_30 = arith.constant 0 : index
    %c4_31 = arith.constant 4 : index
    %40 = vector.load %arg4[%c0_29, %c0_30, %c4_31] : memref<2x22x22xf32, #tpu.memory_space<vmem>>, vector<1x16x16xf32>
    %41 = vector.shape_cast %40 : vector<1x16x16xf32> to vector<16x16xf32>
    %42 = vector.broadcast %39 : f32 to vector<16x16xf32>
    %43 = arith.mulf %42, %41 : vector<16x16xf32>
    %44 = arith.addf %38, %43 : vector<16x16xf32>
    %c5 = arith.constant 5 : index
    %45 = memref.load %arg1[%c5] : memref<98xf32, #tpu.memory_space<smem>>
    %c0_32 = arith.constant 0 : index
    %c0_33 = arith.constant 0 : index
    %c5_34 = arith.constant 5 : index
    %46 = vector.load %arg4[%c0_32, %c0_33, %c5_34] : memref<2x22x22xf32, #tpu.memory_space<vmem>>, vector<1x16x16xf32>
    %47 = vector.shape_cast %46 : vector<1x16x16xf32> to vector<16x16xf32>
    %48 = vector.broadcast %45 : f32 to vector<16x16xf32>
    %49 = arith.mulf %48, %47 : vector<16x16xf32>
    %50 = arith.addf %44, %49 : vector<16x16xf32>
    %c6 = arith.constant 6 : index
    %51 = memref.load %arg1[%c6] : memref<98xf32, #tpu.memory_space<smem>>
    %c0_35 = arith.constant 0 : index
    %c0_36 = arith.constant 0 : index
    %c6_37 = arith.constant 6 : index
    %52 = vector.load %arg4[%c0_35, %c0_36, %c6_37] : memref<2x22x22xf32, #tpu.memory_space<vmem>>, vector<1x16x16xf32>
    %53 = vector.shape_cast %52 : vector<1x16x16xf32> to vector<16x16xf32>
    %54 = vector.broadcast %51 : f32 to vector<16x16xf32>
    %55 = arith.mulf %54, %53 : vector<16x16xf32>
    %56 = arith.addf %50, %55 : vector<16x16xf32>
    %c7 = arith.constant 7 : index
    %57 = memref.load %arg1[%c7] : memref<98xf32, #tpu.memory_space<smem>>
    %c0_38 = arith.constant 0 : index
    %c1_39 = arith.constant 1 : index
    %c0_40 = arith.constant 0 : index
    %58 = vector.load %arg4[%c0_38, %c1_39, %c0_40] : memref<2x22x22xf32, #tpu.memory_space<vmem>>, vector<1x16x16xf32>
    %59 = vector.shape_cast %58 : vector<1x16x16xf32> to vector<16x16xf32>
    %60 = vector.broadcast %57 : f32 to vector<16x16xf32>
    %61 = arith.mulf %60, %59 : vector<16x16xf32>
    %62 = arith.addf %56, %61 : vector<16x16xf32>
    %c8 = arith.constant 8 : index
    %63 = memref.load %arg1[%c8] : memref<98xf32, #tpu.memory_space<smem>>
    %c0_41 = arith.constant 0 : index
    %c1_42 = arith.constant 1 : index
    %c1_43 = arith.constant 1 : index
    %64 = vector.load %arg4[%c0_41, %c1_42, %c1_43] : memref<2x22x22xf32, #tpu.memory_space<vmem>>, vector<1x16x16xf32>
    %65 = vector.shape_cast %64 : vector<1x16x16xf32> to vector<16x16xf32>
    %66 = vector.broadcast %63 : f32 to vector<16x16xf32>
    %67 = arith.mulf %66, %65 : vector<16x16xf32>
    %68 = arith.addf %62, %67 : vector<16x16xf32>
    %c9 = arith.constant 9 : index
    %69 = memref.load %arg1[%c9] : memref<98xf32, #tpu.memory_space<smem>>
    %c0_44 = arith.constant 0 : index
    %c1_45 = arith.constant 1 : index
    %c2_46 = arith.constant 2 : index
    %70 = vector.load %arg4[%c0_44, %c1_45, %c2_46] : memref<2x22x22xf32, #tpu.memory_space<vmem>>, vector<1x16x16xf32>
    %71 = vector.shape_cast %70 : vector<1x16x16xf32> to vector<16x16xf32>
    %72 = vector.broadcast %69 : f32 to vector<16x16xf32>
    %73 = arith.mulf %72, %71 : vector<16x16xf32>
    %74 = arith.addf %68, %73 : vector<16x16xf32>
    %c10 = arith.constant 10 : index
    %75 = memref.load %arg1[%c10] : memref<98xf32, #tpu.memory_space<smem>>
    %c0_47 = arith.constant 0 : index
    %c1_48 = arith.constant 1 : index
    %c3_49 = arith.constant 3 : index
    %76 = vector.load %arg4[%c0_47, %c1_48, %c3_49] : memref<2x22x22xf32, #tpu.memory_space<vmem>>, vector<1x16x16xf32>
    %77 = vector.shape_cast %76 : vector<1x16x16xf32> to vector<16x16xf32>
    %78 = vector.broadcast %75 : f32 to vector<16x16xf32>
    %79 = arith.mulf %78, %77 : vector<16x16xf32>
    %80 = arith.addf %74, %79 : vector<16x16xf32>
    %c11 = arith.constant 11 : index
    %81 = memref.load %arg1[%c11] : memref<98xf32, #tpu.memory_space<smem>>
    %c0_50 = arith.constant 0 : index
    %c1_51 = arith.constant 1 : index
    %c4_52 = arith.constant 4 : index
    %82 = vector.load %arg4[%c0_50, %c1_51, %c4_52] : memref<2x22x22xf32, #tpu.memory_space<vmem>>, vector<1x16x16xf32>
    %83 = vector.shape_cast %82 : vector<1x16x16xf32> to vector<16x16xf32>
    %84 = vector.broadcast %81 : f32 to vector<16x16xf32>
    %85 = arith.mulf %84, %83 : vector<16x16xf32>
    %86 = arith.addf %80, %85 : vector<16x16xf32>
    %c12 = arith.constant 12 : index
    %87 = memref.load %arg1[%c12] : memref<98xf32, #tpu.memory_space<smem>>
    %c0_53 = arith.constant 0 : index
    %c1_54 = arith.constant 1 : index
    %c5_55 = arith.constant 5 : index
    %88 = vector.load %arg4[%c0_53, %c1_54, %c5_55] : memref<2x22x22xf32, #tpu.memory_space<vmem>>, vector<1x16x16xf32>
    %89 = vector.shape_cast %88 : vector<1x16x16xf32> to vector<16x16xf32>
    %90 = vector.broadcast %87 : f32 to vector<16x16xf32>
    %91 = arith.mulf %90, %89 : vector<16x16xf32>
    %92 = arith.addf %86, %91 : vector<16x16xf32>
    %c13 = arith.constant 13 : index
    %93 = memref.load %arg1[%c13] : memref<98xf32, #tpu.memory_space<smem>>
    %c0_56 = arith.constant 0 : index
    %c1_57 = arith.constant 1 : index
    %c6_58 = arith.constant 6 : index
    %94 = vector.load %arg4[%c0_56, %c1_57, %c6_58] : memref<2x22x22xf32, #tpu.memory_space<vmem>>, vector<1x16x16xf32>
    %95 = vector.shape_cast %94 : vector<1x16x16xf32> to vector<16x16xf32>
    %96 = vector.broadcast %93 : f32 to vector<16x16xf32>
    %97 = arith.mulf %96, %95 : vector<16x16xf32>
    %98 = arith.addf %92, %97 : vector<16x16xf32>
    %c14 = arith.constant 14 : index
    %99 = memref.load %arg1[%c14] : memref<98xf32, #tpu.memory_space<smem>>
    %c0_59 = arith.constant 0 : index
    %c2_60 = arith.constant 2 : index
    %c0_61 = arith.constant 0 : index
    %100 = vector.load %arg4[%c0_59, %c2_60, %c0_61] : memref<2x22x22xf32, #tpu.memory_space<vmem>>, vector<1x16x16xf32>
    %101 = vector.shape_cast %100 : vector<1x16x16xf32> to vector<16x16xf32>
    %102 = vector.broadcast %99 : f32 to vector<16x16xf32>
    %103 = arith.mulf %102, %101 : vector<16x16xf32>
    %104 = arith.addf %98, %103 : vector<16x16xf32>
    %c15 = arith.constant 15 : index
    %105 = memref.load %arg1[%c15] : memref<98xf32, #tpu.memory_space<smem>>
    %c0_62 = arith.constant 0 : index
    %c2_63 = arith.constant 2 : index
    %c1_64 = arith.constant 1 : index
    %106 = vector.load %arg4[%c0_62, %c2_63, %c1_64] : memref<2x22x22xf32, #tpu.memory_space<vmem>>, vector<1x16x16xf32>
    %107 = vector.shape_cast %106 : vector<1x16x16xf32> to vector<16x16xf32>
    %108 = vector.broadcast %105 : f32 to vector<16x16xf32>
    %109 = arith.mulf %108, %107 : vector<16x16xf32>
    %110 = arith.addf %104, %109 : vector<16x16xf32>
    %c16 = arith.constant 16 : index
    %111 = memref.load %arg1[%c16] : memref<98xf32, #tpu.memory_space<smem>>
    %c0_65 = arith.constant 0 : index
    %c2_66 = arith.constant 2 : index
    %c2_67 = arith.constant 2 : index
    %112 = vector.load %arg4[%c0_65, %c2_66, %c2_67] : memref<2x22x22xf32, #tpu.memory_space<vmem>>, vector<1x16x16xf32>
    %113 = vector.shape_cast %112 : vector<1x16x16xf32> to vector<16x16xf32>
    %114 = vector.broadcast %111 : f32 to vector<16x16xf32>
    %115 = arith.mulf %114, %113 : vector<16x16xf32>
    %116 = arith.addf %110, %115 : vector<16x16xf32>
    %c17 = arith.constant 17 : index
    %117 = memref.load %arg1[%c17] : memref<98xf32, #tpu.memory_space<smem>>
    %c0_68 = arith.constant 0 : index
    %c2_69 = arith.constant 2 : index
    %c3_70 = arith.constant 3 : index
    %118 = vector.load %arg4[%c0_68, %c2_69, %c3_70] : memref<2x22x22xf32, #tpu.memory_space<vmem>>, vector<1x16x16xf32>
    %119 = vector.shape_cast %118 : vector<1x16x16xf32> to vector<16x16xf32>
    %120 = vector.broadcast %117 : f32 to vector<16x16xf32>
    %121 = arith.mulf %120, %119 : vector<16x16xf32>
    %122 = arith.addf %116, %121 : vector<16x16xf32>
    %c18 = arith.constant 18 : index
    %123 = memref.load %arg1[%c18] : memref<98xf32, #tpu.memory_space<smem>>
    %c0_71 = arith.constant 0 : index
    %c2_72 = arith.constant 2 : index
    %c4_73 = arith.constant 4 : index
    %124 = vector.load %arg4[%c0_71, %c2_72, %c4_73] : memref<2x22x22xf32, #tpu.memory_space<vmem>>, vector<1x16x16xf32>
    %125 = vector.shape_cast %124 : vector<1x16x16xf32> to vector<16x16xf32>
    %126 = vector.broadcast %123 : f32 to vector<16x16xf32>
    %127 = arith.mulf %126, %125 : vector<16x16xf32>
    %128 = arith.addf %122, %127 : vector<16x16xf32>
    %c19 = arith.constant 19 : index
    %129 = memref.load %arg1[%c19] : memref<98xf32, #tpu.memory_space<smem>>
    %c0_74 = arith.constant 0 : index
    %c2_75 = arith.constant 2 : index
    %c5_76 = arith.constant 5 : index
    %130 = vector.load %arg4[%c0_74, %c2_75, %c5_76] : memref<2x22x22xf32, #tpu.memory_space<vmem>>, vector<1x16x16xf32>
    %131 = vector.shape_cast %130 : vector<1x16x16xf32> to vector<16x16xf32>
    %132 = vector.broadcast %129 : f32 to vector<16x16xf32>
    %133 = arith.mulf %132, %131 : vector<16x16xf32>
    %134 = arith.addf %128, %133 : vector<16x16xf32>
    %c20 = arith.constant 20 : index
    %135 = memref.load %arg1[%c20] : memref<98xf32, #tpu.memory_space<smem>>
    %c0_77 = arith.constant 0 : index
    %c2_78 = arith.constant 2 : index
    %c6_79 = arith.constant 6 : index
    %136 = vector.load %arg4[%c0_77, %c2_78, %c6_79] : memref<2x22x22xf32, #tpu.memory_space<vmem>>, vector<1x16x16xf32>
    %137 = vector.shape_cast %136 : vector<1x16x16xf32> to vector<16x16xf32>
    %138 = vector.broadcast %135 : f32 to vector<16x16xf32>
    %139 = arith.mulf %138, %137 : vector<16x16xf32>
    %140 = arith.addf %134, %139 : vector<16x16xf32>
    %c21 = arith.constant 21 : index
    %141 = memref.load %arg1[%c21] : memref<98xf32, #tpu.memory_space<smem>>
    %c0_80 = arith.constant 0 : index
    %c3_81 = arith.constant 3 : index
    %c0_82 = arith.constant 0 : index
    %142 = vector.load %arg4[%c0_80, %c3_81, %c0_82] : memref<2x22x22xf32, #tpu.memory_space<vmem>>, vector<1x16x16xf32>
    %143 = vector.shape_cast %142 : vector<1x16x16xf32> to vector<16x16xf32>
    %144 = vector.broadcast %141 : f32 to vector<16x16xf32>
    %145 = arith.mulf %144, %143 : vector<16x16xf32>
    %146 = arith.addf %140, %145 : vector<16x16xf32>
    %c22 = arith.constant 22 : index
    %147 = memref.load %arg1[%c22] : memref<98xf32, #tpu.memory_space<smem>>
    %c0_83 = arith.constant 0 : index
    %c3_84 = arith.constant 3 : index
    %c1_85 = arith.constant 1 : index
    %148 = vector.load %arg4[%c0_83, %c3_84, %c1_85] : memref<2x22x22xf32, #tpu.memory_space<vmem>>, vector<1x16x16xf32>
    %149 = vector.shape_cast %148 : vector<1x16x16xf32> to vector<16x16xf32>
    %150 = vector.broadcast %147 : f32 to vector<16x16xf32>
    %151 = arith.mulf %150, %149 : vector<16x16xf32>
    %152 = arith.addf %146, %151 : vector<16x16xf32>
    %c23 = arith.constant 23 : index
    %153 = memref.load %arg1[%c23] : memref<98xf32, #tpu.memory_space<smem>>
    %c0_86 = arith.constant 0 : index
    %c3_87 = arith.constant 3 : index
    %c2_88 = arith.constant 2 : index
    %154 = vector.load %arg4[%c0_86, %c3_87, %c2_88] : memref<2x22x22xf32, #tpu.memory_space<vmem>>, vector<1x16x16xf32>
    %155 = vector.shape_cast %154 : vector<1x16x16xf32> to vector<16x16xf32>
    %156 = vector.broadcast %153 : f32 to vector<16x16xf32>
    %157 = arith.mulf %156, %155 : vector<16x16xf32>
    %158 = arith.addf %152, %157 : vector<16x16xf32>
    %c24 = arith.constant 24 : index
    %159 = memref.load %arg1[%c24] : memref<98xf32, #tpu.memory_space<smem>>
    %c0_89 = arith.constant 0 : index
    %c3_90 = arith.constant 3 : index
    %c3_91 = arith.constant 3 : index
    %160 = vector.load %arg4[%c0_89, %c3_90, %c3_91] : memref<2x22x22xf32, #tpu.memory_space<vmem>>, vector<1x16x16xf32>
    %161 = vector.shape_cast %160 : vector<1x16x16xf32> to vector<16x16xf32>
    %162 = vector.broadcast %159 : f32 to vector<16x16xf32>
    %163 = arith.mulf %162, %161 : vector<16x16xf32>
    %164 = arith.addf %158, %163 : vector<16x16xf32>
    %c25 = arith.constant 25 : index
    %165 = memref.load %arg1[%c25] : memref<98xf32, #tpu.memory_space<smem>>
    %c0_92 = arith.constant 0 : index
    %c3_93 = arith.constant 3 : index
    %c4_94 = arith.constant 4 : index
    %166 = vector.load %arg4[%c0_92, %c3_93, %c4_94] : memref<2x22x22xf32, #tpu.memory_space<vmem>>, vector<1x16x16xf32>
    %167 = vector.shape_cast %166 : vector<1x16x16xf32> to vector<16x16xf32>
    %168 = vector.broadcast %165 : f32 to vector<16x16xf32>
    %169 = arith.mulf %168, %167 : vector<16x16xf32>
    %170 = arith.addf %164, %169 : vector<16x16xf32>
    %c26 = arith.constant 26 : index
    %171 = memref.load %arg1[%c26] : memref<98xf32, #tpu.memory_space<smem>>
    %c0_95 = arith.constant 0 : index
    %c3_96 = arith.constant 3 : index
    %c5_97 = arith.constant 5 : index
    %172 = vector.load %arg4[%c0_95, %c3_96, %c5_97] : memref<2x22x22xf32, #tpu.memory_space<vmem>>, vector<1x16x16xf32>
    %173 = vector.shape_cast %172 : vector<1x16x16xf32> to vector<16x16xf32>
    %174 = vector.broadcast %171 : f32 to vector<16x16xf32>
    %175 = arith.mulf %174, %173 : vector<16x16xf32>
    %176 = arith.addf %170, %175 : vector<16x16xf32>
    %c27 = arith.constant 27 : index
    %177 = memref.load %arg1[%c27] : memref<98xf32, #tpu.memory_space<smem>>
    %c0_98 = arith.constant 0 : index
    %c3_99 = arith.constant 3 : index
    %c6_100 = arith.constant 6 : index
    %178 = vector.load %arg4[%c0_98, %c3_99, %c6_100] : memref<2x22x22xf32, #tpu.memory_space<vmem>>, vector<1x16x16xf32>
    %179 = vector.shape_cast %178 : vector<1x16x16xf32> to vector<16x16xf32>
    %180 = vector.broadcast %177 : f32 to vector<16x16xf32>
    %181 = arith.mulf %180, %179 : vector<16x16xf32>
    %182 = arith.addf %176, %181 : vector<16x16xf32>
    %c28 = arith.constant 28 : index
    %183 = memref.load %arg1[%c28] : memref<98xf32, #tpu.memory_space<smem>>
    %c0_101 = arith.constant 0 : index
    %c4_102 = arith.constant 4 : index
    %c0_103 = arith.constant 0 : index
    %184 = vector.load %arg4[%c0_101, %c4_102, %c0_103] : memref<2x22x22xf32, #tpu.memory_space<vmem>>, vector<1x16x16xf32>
    %185 = vector.shape_cast %184 : vector<1x16x16xf32> to vector<16x16xf32>
    %186 = vector.broadcast %183 : f32 to vector<16x16xf32>
    %187 = arith.mulf %186, %185 : vector<16x16xf32>
    %188 = arith.addf %182, %187 : vector<16x16xf32>
    %c29 = arith.constant 29 : index
    %189 = memref.load %arg1[%c29] : memref<98xf32, #tpu.memory_space<smem>>
    %c0_104 = arith.constant 0 : index
    %c4_105 = arith.constant 4 : index
    %c1_106 = arith.constant 1 : index
    %190 = vector.load %arg4[%c0_104, %c4_105, %c1_106] : memref<2x22x22xf32, #tpu.memory_space<vmem>>, vector<1x16x16xf32>
    %191 = vector.shape_cast %190 : vector<1x16x16xf32> to vector<16x16xf32>
    %192 = vector.broadcast %189 : f32 to vector<16x16xf32>
    %193 = arith.mulf %192, %191 : vector<16x16xf32>
    %194 = arith.addf %188, %193 : vector<16x16xf32>
    %c30 = arith.constant 30 : index
    %195 = memref.load %arg1[%c30] : memref<98xf32, #tpu.memory_space<smem>>
    %c0_107 = arith.constant 0 : index
    %c4_108 = arith.constant 4 : index
    %c2_109 = arith.constant 2 : index
    %196 = vector.load %arg4[%c0_107, %c4_108, %c2_109] : memref<2x22x22xf32, #tpu.memory_space<vmem>>, vector<1x16x16xf32>
    %197 = vector.shape_cast %196 : vector<1x16x16xf32> to vector<16x16xf32>
    %198 = vector.broadcast %195 : f32 to vector<16x16xf32>
    %199 = arith.mulf %198, %197 : vector<16x16xf32>
    %200 = arith.addf %194, %199 : vector<16x16xf32>
    %c31 = arith.constant 31 : index
    %201 = memref.load %arg1[%c31] : memref<98xf32, #tpu.memory_space<smem>>
    %c0_110 = arith.constant 0 : index
    %c4_111 = arith.constant 4 : index
    %c3_112 = arith.constant 3 : index
    %202 = vector.load %arg4[%c0_110, %c4_111, %c3_112] : memref<2x22x22xf32, #tpu.memory_space<vmem>>, vector<1x16x16xf32>
    %203 = vector.shape_cast %202 : vector<1x16x16xf32> to vector<16x16xf32>
    %204 = vector.broadcast %201 : f32 to vector<16x16xf32>
    %205 = arith.mulf %204, %203 : vector<16x16xf32>
    %206 = arith.addf %200, %205 : vector<16x16xf32>
    %c32 = arith.constant 32 : index
    %207 = memref.load %arg1[%c32] : memref<98xf32, #tpu.memory_space<smem>>
    %c0_113 = arith.constant 0 : index
    %c4_114 = arith.constant 4 : index
    %c4_115 = arith.constant 4 : index
    %208 = vector.load %arg4[%c0_113, %c4_114, %c4_115] : memref<2x22x22xf32, #tpu.memory_space<vmem>>, vector<1x16x16xf32>
    %209 = vector.shape_cast %208 : vector<1x16x16xf32> to vector<16x16xf32>
    %210 = vector.broadcast %207 : f32 to vector<16x16xf32>
    %211 = arith.mulf %210, %209 : vector<16x16xf32>
    %212 = arith.addf %206, %211 : vector<16x16xf32>
    %c33 = arith.constant 33 : index
    %213 = memref.load %arg1[%c33] : memref<98xf32, #tpu.memory_space<smem>>
    %c0_116 = arith.constant 0 : index
    %c4_117 = arith.constant 4 : index
    %c5_118 = arith.constant 5 : index
    %214 = vector.load %arg4[%c0_116, %c4_117, %c5_118] : memref<2x22x22xf32, #tpu.memory_space<vmem>>, vector<1x16x16xf32>
    %215 = vector.shape_cast %214 : vector<1x16x16xf32> to vector<16x16xf32>
    %216 = vector.broadcast %213 : f32 to vector<16x16xf32>
    %217 = arith.mulf %216, %215 : vector<16x16xf32>
    %218 = arith.addf %212, %217 : vector<16x16xf32>
    %c34 = arith.constant 34 : index
    %219 = memref.load %arg1[%c34] : memref<98xf32, #tpu.memory_space<smem>>
    %c0_119 = arith.constant 0 : index
    %c4_120 = arith.constant 4 : index
    %c6_121 = arith.constant 6 : index
    %220 = vector.load %arg4[%c0_119, %c4_120, %c6_121] : memref<2x22x22xf32, #tpu.memory_space<vmem>>, vector<1x16x16xf32>
    %221 = vector.shape_cast %220 : vector<1x16x16xf32> to vector<16x16xf32>
    %222 = vector.broadcast %219 : f32 to vector<16x16xf32>
    %223 = arith.mulf %222, %221 : vector<16x16xf32>
    %224 = arith.addf %218, %223 : vector<16x16xf32>
    %c35 = arith.constant 35 : index
    %225 = memref.load %arg1[%c35] : memref<98xf32, #tpu.memory_space<smem>>
    %c0_122 = arith.constant 0 : index
    %c5_123 = arith.constant 5 : index
    %c0_124 = arith.constant 0 : index
    %226 = vector.load %arg4[%c0_122, %c5_123, %c0_124] : memref<2x22x22xf32, #tpu.memory_space<vmem>>, vector<1x16x16xf32>
    %227 = vector.shape_cast %226 : vector<1x16x16xf32> to vector<16x16xf32>
    %228 = vector.broadcast %225 : f32 to vector<16x16xf32>
    %229 = arith.mulf %228, %227 : vector<16x16xf32>
    %230 = arith.addf %224, %229 : vector<16x16xf32>
    %c36 = arith.constant 36 : index
    %231 = memref.load %arg1[%c36] : memref<98xf32, #tpu.memory_space<smem>>
    %c0_125 = arith.constant 0 : index
    %c5_126 = arith.constant 5 : index
    %c1_127 = arith.constant 1 : index
    %232 = vector.load %arg4[%c0_125, %c5_126, %c1_127] : memref<2x22x22xf32, #tpu.memory_space<vmem>>, vector<1x16x16xf32>
    %233 = vector.shape_cast %232 : vector<1x16x16xf32> to vector<16x16xf32>
    %234 = vector.broadcast %231 : f32 to vector<16x16xf32>
    %235 = arith.mulf %234, %233 : vector<16x16xf32>
    %236 = arith.addf %230, %235 : vector<16x16xf32>
    %c37 = arith.constant 37 : index
    %237 = memref.load %arg1[%c37] : memref<98xf32, #tpu.memory_space<smem>>
    %c0_128 = arith.constant 0 : index
    %c5_129 = arith.constant 5 : index
    %c2_130 = arith.constant 2 : index
    %238 = vector.load %arg4[%c0_128, %c5_129, %c2_130] : memref<2x22x22xf32, #tpu.memory_space<vmem>>, vector<1x16x16xf32>
    %239 = vector.shape_cast %238 : vector<1x16x16xf32> to vector<16x16xf32>
    %240 = vector.broadcast %237 : f32 to vector<16x16xf32>
    %241 = arith.mulf %240, %239 : vector<16x16xf32>
    %242 = arith.addf %236, %241 : vector<16x16xf32>
    %c38 = arith.constant 38 : index
    %243 = memref.load %arg1[%c38] : memref<98xf32, #tpu.memory_space<smem>>
    %c0_131 = arith.constant 0 : index
    %c5_132 = arith.constant 5 : index
    %c3_133 = arith.constant 3 : index
    %244 = vector.load %arg4[%c0_131, %c5_132, %c3_133] : memref<2x22x22xf32, #tpu.memory_space<vmem>>, vector<1x16x16xf32>
    %245 = vector.shape_cast %244 : vector<1x16x16xf32> to vector<16x16xf32>
    %246 = vector.broadcast %243 : f32 to vector<16x16xf32>
    %247 = arith.mulf %246, %245 : vector<16x16xf32>
    %248 = arith.addf %242, %247 : vector<16x16xf32>
    %c39 = arith.constant 39 : index
    %249 = memref.load %arg1[%c39] : memref<98xf32, #tpu.memory_space<smem>>
    %c0_134 = arith.constant 0 : index
    %c5_135 = arith.constant 5 : index
    %c4_136 = arith.constant 4 : index
    %250 = vector.load %arg4[%c0_134, %c5_135, %c4_136] : memref<2x22x22xf32, #tpu.memory_space<vmem>>, vector<1x16x16xf32>
    %251 = vector.shape_cast %250 : vector<1x16x16xf32> to vector<16x16xf32>
    %252 = vector.broadcast %249 : f32 to vector<16x16xf32>
    %253 = arith.mulf %252, %251 : vector<16x16xf32>
    %254 = arith.addf %248, %253 : vector<16x16xf32>
    %c40 = arith.constant 40 : index
    %255 = memref.load %arg1[%c40] : memref<98xf32, #tpu.memory_space<smem>>
    %c0_137 = arith.constant 0 : index
    %c5_138 = arith.constant 5 : index
    %c5_139 = arith.constant 5 : index
    %256 = vector.load %arg4[%c0_137, %c5_138, %c5_139] : memref<2x22x22xf32, #tpu.memory_space<vmem>>, vector<1x16x16xf32>
    %257 = vector.shape_cast %256 : vector<1x16x16xf32> to vector<16x16xf32>
    %258 = vector.broadcast %255 : f32 to vector<16x16xf32>
    %259 = arith.mulf %258, %257 : vector<16x16xf32>
    %260 = arith.addf %254, %259 : vector<16x16xf32>
    %c41 = arith.constant 41 : index
    %261 = memref.load %arg1[%c41] : memref<98xf32, #tpu.memory_space<smem>>
    %c0_140 = arith.constant 0 : index
    %c5_141 = arith.constant 5 : index
    %c6_142 = arith.constant 6 : index
    %262 = vector.load %arg4[%c0_140, %c5_141, %c6_142] : memref<2x22x22xf32, #tpu.memory_space<vmem>>, vector<1x16x16xf32>
    %263 = vector.shape_cast %262 : vector<1x16x16xf32> to vector<16x16xf32>
    %264 = vector.broadcast %261 : f32 to vector<16x16xf32>
    %265 = arith.mulf %264, %263 : vector<16x16xf32>
    %266 = arith.addf %260, %265 : vector<16x16xf32>
    %c42 = arith.constant 42 : index
    %267 = memref.load %arg1[%c42] : memref<98xf32, #tpu.memory_space<smem>>
    %c0_143 = arith.constant 0 : index
    %c6_144 = arith.constant 6 : index
    %c0_145 = arith.constant 0 : index
    %268 = vector.load %arg4[%c0_143, %c6_144, %c0_145] : memref<2x22x22xf32, #tpu.memory_space<vmem>>, vector<1x16x16xf32>
    %269 = vector.shape_cast %268 : vector<1x16x16xf32> to vector<16x16xf32>
    %270 = vector.broadcast %267 : f32 to vector<16x16xf32>
    %271 = arith.mulf %270, %269 : vector<16x16xf32>
    %272 = arith.addf %266, %271 : vector<16x16xf32>
    %c43 = arith.constant 43 : index
    %273 = memref.load %arg1[%c43] : memref<98xf32, #tpu.memory_space<smem>>
    %c0_146 = arith.constant 0 : index
    %c6_147 = arith.constant 6 : index
    %c1_148 = arith.constant 1 : index
    %274 = vector.load %arg4[%c0_146, %c6_147, %c1_148] : memref<2x22x22xf32, #tpu.memory_space<vmem>>, vector<1x16x16xf32>
    %275 = vector.shape_cast %274 : vector<1x16x16xf32> to vector<16x16xf32>
    %276 = vector.broadcast %273 : f32 to vector<16x16xf32>
    %277 = arith.mulf %276, %275 : vector<16x16xf32>
    %278 = arith.addf %272, %277 : vector<16x16xf32>
    %c44 = arith.constant 44 : index
    %279 = memref.load %arg1[%c44] : memref<98xf32, #tpu.memory_space<smem>>
    %c0_149 = arith.constant 0 : index
    %c6_150 = arith.constant 6 : index
    %c2_151 = arith.constant 2 : index
    %280 = vector.load %arg4[%c0_149, %c6_150, %c2_151] : memref<2x22x22xf32, #tpu.memory_space<vmem>>, vector<1x16x16xf32>
    %281 = vector.shape_cast %280 : vector<1x16x16xf32> to vector<16x16xf32>
    %282 = vector.broadcast %279 : f32 to vector<16x16xf32>
    %283 = arith.mulf %282, %281 : vector<16x16xf32>
    %284 = arith.addf %278, %283 : vector<16x16xf32>
    %c45 = arith.constant 45 : index
    %285 = memref.load %arg1[%c45] : memref<98xf32, #tpu.memory_space<smem>>
    %c0_152 = arith.constant 0 : index
    %c6_153 = arith.constant 6 : index
    %c3_154 = arith.constant 3 : index
    %286 = vector.load %arg4[%c0_152, %c6_153, %c3_154] : memref<2x22x22xf32, #tpu.memory_space<vmem>>, vector<1x16x16xf32>
    %287 = vector.shape_cast %286 : vector<1x16x16xf32> to vector<16x16xf32>
    %288 = vector.broadcast %285 : f32 to vector<16x16xf32>
    %289 = arith.mulf %288, %287 : vector<16x16xf32>
    %290 = arith.addf %284, %289 : vector<16x16xf32>
    %c46 = arith.constant 46 : index
    %291 = memref.load %arg1[%c46] : memref<98xf32, #tpu.memory_space<smem>>
    %c0_155 = arith.constant 0 : index
    %c6_156 = arith.constant 6 : index
    %c4_157 = arith.constant 4 : index
    %292 = vector.load %arg4[%c0_155, %c6_156, %c4_157] : memref<2x22x22xf32, #tpu.memory_space<vmem>>, vector<1x16x16xf32>
    %293 = vector.shape_cast %292 : vector<1x16x16xf32> to vector<16x16xf32>
    %294 = vector.broadcast %291 : f32 to vector<16x16xf32>
    %295 = arith.mulf %294, %293 : vector<16x16xf32>
    %296 = arith.addf %290, %295 : vector<16x16xf32>
    %c47 = arith.constant 47 : index
    %297 = memref.load %arg1[%c47] : memref<98xf32, #tpu.memory_space<smem>>
    %c0_158 = arith.constant 0 : index
    %c6_159 = arith.constant 6 : index
    %c5_160 = arith.constant 5 : index
    %298 = vector.load %arg4[%c0_158, %c6_159, %c5_160] : memref<2x22x22xf32, #tpu.memory_space<vmem>>, vector<1x16x16xf32>
    %299 = vector.shape_cast %298 : vector<1x16x16xf32> to vector<16x16xf32>
    %300 = vector.broadcast %297 : f32 to vector<16x16xf32>
    %301 = arith.mulf %300, %299 : vector<16x16xf32>
    %302 = arith.addf %296, %301 : vector<16x16xf32>
    %c48 = arith.constant 48 : index
    %303 = memref.load %arg1[%c48] : memref<98xf32, #tpu.memory_space<smem>>
    %c0_161 = arith.constant 0 : index
    %c6_162 = arith.constant 6 : index
    %c6_163 = arith.constant 6 : index
    %304 = vector.load %arg4[%c0_161, %c6_162, %c6_163] : memref<2x22x22xf32, #tpu.memory_space<vmem>>, vector<1x16x16xf32>
    %305 = vector.shape_cast %304 : vector<1x16x16xf32> to vector<16x16xf32>
    %306 = vector.broadcast %303 : f32 to vector<16x16xf32>
    %307 = arith.mulf %306, %305 : vector<16x16xf32>
    %308 = arith.addf %302, %307 : vector<16x16xf32>
    %c49 = arith.constant 49 : index
    %309 = memref.load %arg1[%c49] : memref<98xf32, #tpu.memory_space<smem>>
    %c1_164 = arith.constant 1 : index
    %c0_165 = arith.constant 0 : index
    %c0_166 = arith.constant 0 : index
    %310 = vector.load %arg4[%c1_164, %c0_165, %c0_166] : memref<2x22x22xf32, #tpu.memory_space<vmem>>, vector<1x16x16xf32>
    %311 = vector.shape_cast %310 : vector<1x16x16xf32> to vector<16x16xf32>
    %312 = vector.broadcast %309 : f32 to vector<16x16xf32>
    %313 = arith.mulf %312, %311 : vector<16x16xf32>
    %314 = arith.addf %308, %313 : vector<16x16xf32>
    %c50 = arith.constant 50 : index
    %315 = memref.load %arg1[%c50] : memref<98xf32, #tpu.memory_space<smem>>
    %c1_167 = arith.constant 1 : index
    %c0_168 = arith.constant 0 : index
    %c1_169 = arith.constant 1 : index
    %316 = vector.load %arg4[%c1_167, %c0_168, %c1_169] : memref<2x22x22xf32, #tpu.memory_space<vmem>>, vector<1x16x16xf32>
    %317 = vector.shape_cast %316 : vector<1x16x16xf32> to vector<16x16xf32>
    %318 = vector.broadcast %315 : f32 to vector<16x16xf32>
    %319 = arith.mulf %318, %317 : vector<16x16xf32>
    %320 = arith.addf %314, %319 : vector<16x16xf32>
    %c51 = arith.constant 51 : index
    %321 = memref.load %arg1[%c51] : memref<98xf32, #tpu.memory_space<smem>>
    %c1_170 = arith.constant 1 : index
    %c0_171 = arith.constant 0 : index
    %c2_172 = arith.constant 2 : index
    %322 = vector.load %arg4[%c1_170, %c0_171, %c2_172] : memref<2x22x22xf32, #tpu.memory_space<vmem>>, vector<1x16x16xf32>
    %323 = vector.shape_cast %322 : vector<1x16x16xf32> to vector<16x16xf32>
    %324 = vector.broadcast %321 : f32 to vector<16x16xf32>
    %325 = arith.mulf %324, %323 : vector<16x16xf32>
    %326 = arith.addf %320, %325 : vector<16x16xf32>
    %c52 = arith.constant 52 : index
    %327 = memref.load %arg1[%c52] : memref<98xf32, #tpu.memory_space<smem>>
    %c1_173 = arith.constant 1 : index
    %c0_174 = arith.constant 0 : index
    %c3_175 = arith.constant 3 : index
    %328 = vector.load %arg4[%c1_173, %c0_174, %c3_175] : memref<2x22x22xf32, #tpu.memory_space<vmem>>, vector<1x16x16xf32>
    %329 = vector.shape_cast %328 : vector<1x16x16xf32> to vector<16x16xf32>
    %330 = vector.broadcast %327 : f32 to vector<16x16xf32>
    %331 = arith.mulf %330, %329 : vector<16x16xf32>
    %332 = arith.addf %326, %331 : vector<16x16xf32>
    %c53 = arith.constant 53 : index
    %333 = memref.load %arg1[%c53] : memref<98xf32, #tpu.memory_space<smem>>
    %c1_176 = arith.constant 1 : index
    %c0_177 = arith.constant 0 : index
    %c4_178 = arith.constant 4 : index
    %334 = vector.load %arg4[%c1_176, %c0_177, %c4_178] : memref<2x22x22xf32, #tpu.memory_space<vmem>>, vector<1x16x16xf32>
    %335 = vector.shape_cast %334 : vector<1x16x16xf32> to vector<16x16xf32>
    %336 = vector.broadcast %333 : f32 to vector<16x16xf32>
    %337 = arith.mulf %336, %335 : vector<16x16xf32>
    %338 = arith.addf %332, %337 : vector<16x16xf32>
    %c54 = arith.constant 54 : index
    %339 = memref.load %arg1[%c54] : memref<98xf32, #tpu.memory_space<smem>>
    %c1_179 = arith.constant 1 : index
    %c0_180 = arith.constant 0 : index
    %c5_181 = arith.constant 5 : index
    %340 = vector.load %arg4[%c1_179, %c0_180, %c5_181] : memref<2x22x22xf32, #tpu.memory_space<vmem>>, vector<1x16x16xf32>
    %341 = vector.shape_cast %340 : vector<1x16x16xf32> to vector<16x16xf32>
    %342 = vector.broadcast %339 : f32 to vector<16x16xf32>
    %343 = arith.mulf %342, %341 : vector<16x16xf32>
    %344 = arith.addf %338, %343 : vector<16x16xf32>
    %c55 = arith.constant 55 : index
    %345 = memref.load %arg1[%c55] : memref<98xf32, #tpu.memory_space<smem>>
    %c1_182 = arith.constant 1 : index
    %c0_183 = arith.constant 0 : index
    %c6_184 = arith.constant 6 : index
    %346 = vector.load %arg4[%c1_182, %c0_183, %c6_184] : memref<2x22x22xf32, #tpu.memory_space<vmem>>, vector<1x16x16xf32>
    %347 = vector.shape_cast %346 : vector<1x16x16xf32> to vector<16x16xf32>
    %348 = vector.broadcast %345 : f32 to vector<16x16xf32>
    %349 = arith.mulf %348, %347 : vector<16x16xf32>
    %350 = arith.addf %344, %349 : vector<16x16xf32>
    %c56 = arith.constant 56 : index
    %351 = memref.load %arg1[%c56] : memref<98xf32, #tpu.memory_space<smem>>
    %c1_185 = arith.constant 1 : index
    %c1_186 = arith.constant 1 : index
    %c0_187 = arith.constant 0 : index
    %352 = vector.load %arg4[%c1_185, %c1_186, %c0_187] : memref<2x22x22xf32, #tpu.memory_space<vmem>>, vector<1x16x16xf32>
    %353 = vector.shape_cast %352 : vector<1x16x16xf32> to vector<16x16xf32>
    %354 = vector.broadcast %351 : f32 to vector<16x16xf32>
    %355 = arith.mulf %354, %353 : vector<16x16xf32>
    %356 = arith.addf %350, %355 : vector<16x16xf32>
    %c57 = arith.constant 57 : index
    %357 = memref.load %arg1[%c57] : memref<98xf32, #tpu.memory_space<smem>>
    %c1_188 = arith.constant 1 : index
    %c1_189 = arith.constant 1 : index
    %c1_190 = arith.constant 1 : index
    %358 = vector.load %arg4[%c1_188, %c1_189, %c1_190] : memref<2x22x22xf32, #tpu.memory_space<vmem>>, vector<1x16x16xf32>
    %359 = vector.shape_cast %358 : vector<1x16x16xf32> to vector<16x16xf32>
    %360 = vector.broadcast %357 : f32 to vector<16x16xf32>
    %361 = arith.mulf %360, %359 : vector<16x16xf32>
    %362 = arith.addf %356, %361 : vector<16x16xf32>
    %c58 = arith.constant 58 : index
    %363 = memref.load %arg1[%c58] : memref<98xf32, #tpu.memory_space<smem>>
    %c1_191 = arith.constant 1 : index
    %c1_192 = arith.constant 1 : index
    %c2_193 = arith.constant 2 : index
    %364 = vector.load %arg4[%c1_191, %c1_192, %c2_193] : memref<2x22x22xf32, #tpu.memory_space<vmem>>, vector<1x16x16xf32>
    %365 = vector.shape_cast %364 : vector<1x16x16xf32> to vector<16x16xf32>
    %366 = vector.broadcast %363 : f32 to vector<16x16xf32>
    %367 = arith.mulf %366, %365 : vector<16x16xf32>
    %368 = arith.addf %362, %367 : vector<16x16xf32>
    %c59 = arith.constant 59 : index
    %369 = memref.load %arg1[%c59] : memref<98xf32, #tpu.memory_space<smem>>
    %c1_194 = arith.constant 1 : index
    %c1_195 = arith.constant 1 : index
    %c3_196 = arith.constant 3 : index
    %370 = vector.load %arg4[%c1_194, %c1_195, %c3_196] : memref<2x22x22xf32, #tpu.memory_space<vmem>>, vector<1x16x16xf32>
    %371 = vector.shape_cast %370 : vector<1x16x16xf32> to vector<16x16xf32>
    %372 = vector.broadcast %369 : f32 to vector<16x16xf32>
    %373 = arith.mulf %372, %371 : vector<16x16xf32>
    %374 = arith.addf %368, %373 : vector<16x16xf32>
    %c60 = arith.constant 60 : index
    %375 = memref.load %arg1[%c60] : memref<98xf32, #tpu.memory_space<smem>>
    %c1_197 = arith.constant 1 : index
    %c1_198 = arith.constant 1 : index
    %c4_199 = arith.constant 4 : index
    %376 = vector.load %arg4[%c1_197, %c1_198, %c4_199] : memref<2x22x22xf32, #tpu.memory_space<vmem>>, vector<1x16x16xf32>
    %377 = vector.shape_cast %376 : vector<1x16x16xf32> to vector<16x16xf32>
    %378 = vector.broadcast %375 : f32 to vector<16x16xf32>
    %379 = arith.mulf %378, %377 : vector<16x16xf32>
    %380 = arith.addf %374, %379 : vector<16x16xf32>
    %c61 = arith.constant 61 : index
    %381 = memref.load %arg1[%c61] : memref<98xf32, #tpu.memory_space<smem>>
    %c1_200 = arith.constant 1 : index
    %c1_201 = arith.constant 1 : index
    %c5_202 = arith.constant 5 : index
    %382 = vector.load %arg4[%c1_200, %c1_201, %c5_202] : memref<2x22x22xf32, #tpu.memory_space<vmem>>, vector<1x16x16xf32>
    %383 = vector.shape_cast %382 : vector<1x16x16xf32> to vector<16x16xf32>
    %384 = vector.broadcast %381 : f32 to vector<16x16xf32>
    %385 = arith.mulf %384, %383 : vector<16x16xf32>
    %386 = arith.addf %380, %385 : vector<16x16xf32>
    %c62 = arith.constant 62 : index
    %387 = memref.load %arg1[%c62] : memref<98xf32, #tpu.memory_space<smem>>
    %c1_203 = arith.constant 1 : index
    %c1_204 = arith.constant 1 : index
    %c6_205 = arith.constant 6 : index
    %388 = vector.load %arg4[%c1_203, %c1_204, %c6_205] : memref<2x22x22xf32, #tpu.memory_space<vmem>>, vector<1x16x16xf32>
    %389 = vector.shape_cast %388 : vector<1x16x16xf32> to vector<16x16xf32>
    %390 = vector.broadcast %387 : f32 to vector<16x16xf32>
    %391 = arith.mulf %390, %389 : vector<16x16xf32>
    %392 = arith.addf %386, %391 : vector<16x16xf32>
    %c63 = arith.constant 63 : index
    %393 = memref.load %arg1[%c63] : memref<98xf32, #tpu.memory_space<smem>>
    %c1_206 = arith.constant 1 : index
    %c2_207 = arith.constant 2 : index
    %c0_208 = arith.constant 0 : index
    %394 = vector.load %arg4[%c1_206, %c2_207, %c0_208] : memref<2x22x22xf32, #tpu.memory_space<vmem>>, vector<1x16x16xf32>
    %395 = vector.shape_cast %394 : vector<1x16x16xf32> to vector<16x16xf32>
    %396 = vector.broadcast %393 : f32 to vector<16x16xf32>
    %397 = arith.mulf %396, %395 : vector<16x16xf32>
    %398 = arith.addf %392, %397 : vector<16x16xf32>
    %c64 = arith.constant 64 : index
    %399 = memref.load %arg1[%c64] : memref<98xf32, #tpu.memory_space<smem>>
    %c1_209 = arith.constant 1 : index
    %c2_210 = arith.constant 2 : index
    %c1_211 = arith.constant 1 : index
    %400 = vector.load %arg4[%c1_209, %c2_210, %c1_211] : memref<2x22x22xf32, #tpu.memory_space<vmem>>, vector<1x16x16xf32>
    %401 = vector.shape_cast %400 : vector<1x16x16xf32> to vector<16x16xf32>
    %402 = vector.broadcast %399 : f32 to vector<16x16xf32>
    %403 = arith.mulf %402, %401 : vector<16x16xf32>
    %404 = arith.addf %398, %403 : vector<16x16xf32>
    %c65 = arith.constant 65 : index
    %405 = memref.load %arg1[%c65] : memref<98xf32, #tpu.memory_space<smem>>
    %c1_212 = arith.constant 1 : index
    %c2_213 = arith.constant 2 : index
    %c2_214 = arith.constant 2 : index
    %406 = vector.load %arg4[%c1_212, %c2_213, %c2_214] : memref<2x22x22xf32, #tpu.memory_space<vmem>>, vector<1x16x16xf32>
    %407 = vector.shape_cast %406 : vector<1x16x16xf32> to vector<16x16xf32>
    %408 = vector.broadcast %405 : f32 to vector<16x16xf32>
    %409 = arith.mulf %408, %407 : vector<16x16xf32>
    %410 = arith.addf %404, %409 : vector<16x16xf32>
    %c66 = arith.constant 66 : index
    %411 = memref.load %arg1[%c66] : memref<98xf32, #tpu.memory_space<smem>>
    %c1_215 = arith.constant 1 : index
    %c2_216 = arith.constant 2 : index
    %c3_217 = arith.constant 3 : index
    %412 = vector.load %arg4[%c1_215, %c2_216, %c3_217] : memref<2x22x22xf32, #tpu.memory_space<vmem>>, vector<1x16x16xf32>
    %413 = vector.shape_cast %412 : vector<1x16x16xf32> to vector<16x16xf32>
    %414 = vector.broadcast %411 : f32 to vector<16x16xf32>
    %415 = arith.mulf %414, %413 : vector<16x16xf32>
    %416 = arith.addf %410, %415 : vector<16x16xf32>
    %c67 = arith.constant 67 : index
    %417 = memref.load %arg1[%c67] : memref<98xf32, #tpu.memory_space<smem>>
    %c1_218 = arith.constant 1 : index
    %c2_219 = arith.constant 2 : index
    %c4_220 = arith.constant 4 : index
    %418 = vector.load %arg4[%c1_218, %c2_219, %c4_220] : memref<2x22x22xf32, #tpu.memory_space<vmem>>, vector<1x16x16xf32>
    %419 = vector.shape_cast %418 : vector<1x16x16xf32> to vector<16x16xf32>
    %420 = vector.broadcast %417 : f32 to vector<16x16xf32>
    %421 = arith.mulf %420, %419 : vector<16x16xf32>
    %422 = arith.addf %416, %421 : vector<16x16xf32>
    %c68 = arith.constant 68 : index
    %423 = memref.load %arg1[%c68] : memref<98xf32, #tpu.memory_space<smem>>
    %c1_221 = arith.constant 1 : index
    %c2_222 = arith.constant 2 : index
    %c5_223 = arith.constant 5 : index
    %424 = vector.load %arg4[%c1_221, %c2_222, %c5_223] : memref<2x22x22xf32, #tpu.memory_space<vmem>>, vector<1x16x16xf32>
    %425 = vector.shape_cast %424 : vector<1x16x16xf32> to vector<16x16xf32>
    %426 = vector.broadcast %423 : f32 to vector<16x16xf32>
    %427 = arith.mulf %426, %425 : vector<16x16xf32>
    %428 = arith.addf %422, %427 : vector<16x16xf32>
    %c69 = arith.constant 69 : index
    %429 = memref.load %arg1[%c69] : memref<98xf32, #tpu.memory_space<smem>>
    %c1_224 = arith.constant 1 : index
    %c2_225 = arith.constant 2 : index
    %c6_226 = arith.constant 6 : index
    %430 = vector.load %arg4[%c1_224, %c2_225, %c6_226] : memref<2x22x22xf32, #tpu.memory_space<vmem>>, vector<1x16x16xf32>
    %431 = vector.shape_cast %430 : vector<1x16x16xf32> to vector<16x16xf32>
    %432 = vector.broadcast %429 : f32 to vector<16x16xf32>
    %433 = arith.mulf %432, %431 : vector<16x16xf32>
    %434 = arith.addf %428, %433 : vector<16x16xf32>
    %c70 = arith.constant 70 : index
    %435 = memref.load %arg1[%c70] : memref<98xf32, #tpu.memory_space<smem>>
    %c1_227 = arith.constant 1 : index
    %c3_228 = arith.constant 3 : index
    %c0_229 = arith.constant 0 : index
    %436 = vector.load %arg4[%c1_227, %c3_228, %c0_229] : memref<2x22x22xf32, #tpu.memory_space<vmem>>, vector<1x16x16xf32>
    %437 = vector.shape_cast %436 : vector<1x16x16xf32> to vector<16x16xf32>
    %438 = vector.broadcast %435 : f32 to vector<16x16xf32>
    %439 = arith.mulf %438, %437 : vector<16x16xf32>
    %440 = arith.addf %434, %439 : vector<16x16xf32>
    %c71 = arith.constant 71 : index
    %441 = memref.load %arg1[%c71] : memref<98xf32, #tpu.memory_space<smem>>
    %c1_230 = arith.constant 1 : index
    %c3_231 = arith.constant 3 : index
    %c1_232 = arith.constant 1 : index
    %442 = vector.load %arg4[%c1_230, %c3_231, %c1_232] : memref<2x22x22xf32, #tpu.memory_space<vmem>>, vector<1x16x16xf32>
    %443 = vector.shape_cast %442 : vector<1x16x16xf32> to vector<16x16xf32>
    %444 = vector.broadcast %441 : f32 to vector<16x16xf32>
    %445 = arith.mulf %444, %443 : vector<16x16xf32>
    %446 = arith.addf %440, %445 : vector<16x16xf32>
    %c72 = arith.constant 72 : index
    %447 = memref.load %arg1[%c72] : memref<98xf32, #tpu.memory_space<smem>>
    %c1_233 = arith.constant 1 : index
    %c3_234 = arith.constant 3 : index
    %c2_235 = arith.constant 2 : index
    %448 = vector.load %arg4[%c1_233, %c3_234, %c2_235] : memref<2x22x22xf32, #tpu.memory_space<vmem>>, vector<1x16x16xf32>
    %449 = vector.shape_cast %448 : vector<1x16x16xf32> to vector<16x16xf32>
    %450 = vector.broadcast %447 : f32 to vector<16x16xf32>
    %451 = arith.mulf %450, %449 : vector<16x16xf32>
    %452 = arith.addf %446, %451 : vector<16x16xf32>
    %c73 = arith.constant 73 : index
    %453 = memref.load %arg1[%c73] : memref<98xf32, #tpu.memory_space<smem>>
    %c1_236 = arith.constant 1 : index
    %c3_237 = arith.constant 3 : index
    %c3_238 = arith.constant 3 : index
    %454 = vector.load %arg4[%c1_236, %c3_237, %c3_238] : memref<2x22x22xf32, #tpu.memory_space<vmem>>, vector<1x16x16xf32>
    %455 = vector.shape_cast %454 : vector<1x16x16xf32> to vector<16x16xf32>
    %456 = vector.broadcast %453 : f32 to vector<16x16xf32>
    %457 = arith.mulf %456, %455 : vector<16x16xf32>
    %458 = arith.addf %452, %457 : vector<16x16xf32>
    %c74 = arith.constant 74 : index
    %459 = memref.load %arg1[%c74] : memref<98xf32, #tpu.memory_space<smem>>
    %c1_239 = arith.constant 1 : index
    %c3_240 = arith.constant 3 : index
    %c4_241 = arith.constant 4 : index
    %460 = vector.load %arg4[%c1_239, %c3_240, %c4_241] : memref<2x22x22xf32, #tpu.memory_space<vmem>>, vector<1x16x16xf32>
    %461 = vector.shape_cast %460 : vector<1x16x16xf32> to vector<16x16xf32>
    %462 = vector.broadcast %459 : f32 to vector<16x16xf32>
    %463 = arith.mulf %462, %461 : vector<16x16xf32>
    %464 = arith.addf %458, %463 : vector<16x16xf32>
    %c75 = arith.constant 75 : index
    %465 = memref.load %arg1[%c75] : memref<98xf32, #tpu.memory_space<smem>>
    %c1_242 = arith.constant 1 : index
    %c3_243 = arith.constant 3 : index
    %c5_244 = arith.constant 5 : index
    %466 = vector.load %arg4[%c1_242, %c3_243, %c5_244] : memref<2x22x22xf32, #tpu.memory_space<vmem>>, vector<1x16x16xf32>
    %467 = vector.shape_cast %466 : vector<1x16x16xf32> to vector<16x16xf32>
    %468 = vector.broadcast %465 : f32 to vector<16x16xf32>
    %469 = arith.mulf %468, %467 : vector<16x16xf32>
    %470 = arith.addf %464, %469 : vector<16x16xf32>
    %c76 = arith.constant 76 : index
    %471 = memref.load %arg1[%c76] : memref<98xf32, #tpu.memory_space<smem>>
    %c1_245 = arith.constant 1 : index
    %c3_246 = arith.constant 3 : index
    %c6_247 = arith.constant 6 : index
    %472 = vector.load %arg4[%c1_245, %c3_246, %c6_247] : memref<2x22x22xf32, #tpu.memory_space<vmem>>, vector<1x16x16xf32>
    %473 = vector.shape_cast %472 : vector<1x16x16xf32> to vector<16x16xf32>
    %474 = vector.broadcast %471 : f32 to vector<16x16xf32>
    %475 = arith.mulf %474, %473 : vector<16x16xf32>
    %476 = arith.addf %470, %475 : vector<16x16xf32>
    %c77 = arith.constant 77 : index
    %477 = memref.load %arg1[%c77] : memref<98xf32, #tpu.memory_space<smem>>
    %c1_248 = arith.constant 1 : index
    %c4_249 = arith.constant 4 : index
    %c0_250 = arith.constant 0 : index
    %478 = vector.load %arg4[%c1_248, %c4_249, %c0_250] : memref<2x22x22xf32, #tpu.memory_space<vmem>>, vector<1x16x16xf32>
    %479 = vector.shape_cast %478 : vector<1x16x16xf32> to vector<16x16xf32>
    %480 = vector.broadcast %477 : f32 to vector<16x16xf32>
    %481 = arith.mulf %480, %479 : vector<16x16xf32>
    %482 = arith.addf %476, %481 : vector<16x16xf32>
    %c78 = arith.constant 78 : index
    %483 = memref.load %arg1[%c78] : memref<98xf32, #tpu.memory_space<smem>>
    %c1_251 = arith.constant 1 : index
    %c4_252 = arith.constant 4 : index
    %c1_253 = arith.constant 1 : index
    %484 = vector.load %arg4[%c1_251, %c4_252, %c1_253] : memref<2x22x22xf32, #tpu.memory_space<vmem>>, vector<1x16x16xf32>
    %485 = vector.shape_cast %484 : vector<1x16x16xf32> to vector<16x16xf32>
    %486 = vector.broadcast %483 : f32 to vector<16x16xf32>
    %487 = arith.mulf %486, %485 : vector<16x16xf32>
    %488 = arith.addf %482, %487 : vector<16x16xf32>
    %c79 = arith.constant 79 : index
    %489 = memref.load %arg1[%c79] : memref<98xf32, #tpu.memory_space<smem>>
    %c1_254 = arith.constant 1 : index
    %c4_255 = arith.constant 4 : index
    %c2_256 = arith.constant 2 : index
    %490 = vector.load %arg4[%c1_254, %c4_255, %c2_256] : memref<2x22x22xf32, #tpu.memory_space<vmem>>, vector<1x16x16xf32>
    %491 = vector.shape_cast %490 : vector<1x16x16xf32> to vector<16x16xf32>
    %492 = vector.broadcast %489 : f32 to vector<16x16xf32>
    %493 = arith.mulf %492, %491 : vector<16x16xf32>
    %494 = arith.addf %488, %493 : vector<16x16xf32>
    %c80 = arith.constant 80 : index
    %495 = memref.load %arg1[%c80] : memref<98xf32, #tpu.memory_space<smem>>
    %c1_257 = arith.constant 1 : index
    %c4_258 = arith.constant 4 : index
    %c3_259 = arith.constant 3 : index
    %496 = vector.load %arg4[%c1_257, %c4_258, %c3_259] : memref<2x22x22xf32, #tpu.memory_space<vmem>>, vector<1x16x16xf32>
    %497 = vector.shape_cast %496 : vector<1x16x16xf32> to vector<16x16xf32>
    %498 = vector.broadcast %495 : f32 to vector<16x16xf32>
    %499 = arith.mulf %498, %497 : vector<16x16xf32>
    %500 = arith.addf %494, %499 : vector<16x16xf32>
    %c81 = arith.constant 81 : index
    %501 = memref.load %arg1[%c81] : memref<98xf32, #tpu.memory_space<smem>>
    %c1_260 = arith.constant 1 : index
    %c4_261 = arith.constant 4 : index
    %c4_262 = arith.constant 4 : index
    %502 = vector.load %arg4[%c1_260, %c4_261, %c4_262] : memref<2x22x22xf32, #tpu.memory_space<vmem>>, vector<1x16x16xf32>
    %503 = vector.shape_cast %502 : vector<1x16x16xf32> to vector<16x16xf32>
    %504 = vector.broadcast %501 : f32 to vector<16x16xf32>
    %505 = arith.mulf %504, %503 : vector<16x16xf32>
    %506 = arith.addf %500, %505 : vector<16x16xf32>
    %c82 = arith.constant 82 : index
    %507 = memref.load %arg1[%c82] : memref<98xf32, #tpu.memory_space<smem>>
    %c1_263 = arith.constant 1 : index
    %c4_264 = arith.constant 4 : index
    %c5_265 = arith.constant 5 : index
    %508 = vector.load %arg4[%c1_263, %c4_264, %c5_265] : memref<2x22x22xf32, #tpu.memory_space<vmem>>, vector<1x16x16xf32>
    %509 = vector.shape_cast %508 : vector<1x16x16xf32> to vector<16x16xf32>
    %510 = vector.broadcast %507 : f32 to vector<16x16xf32>
    %511 = arith.mulf %510, %509 : vector<16x16xf32>
    %512 = arith.addf %506, %511 : vector<16x16xf32>
    %c83 = arith.constant 83 : index
    %513 = memref.load %arg1[%c83] : memref<98xf32, #tpu.memory_space<smem>>
    %c1_266 = arith.constant 1 : index
    %c4_267 = arith.constant 4 : index
    %c6_268 = arith.constant 6 : index
    %514 = vector.load %arg4[%c1_266, %c4_267, %c6_268] : memref<2x22x22xf32, #tpu.memory_space<vmem>>, vector<1x16x16xf32>
    %515 = vector.shape_cast %514 : vector<1x16x16xf32> to vector<16x16xf32>
    %516 = vector.broadcast %513 : f32 to vector<16x16xf32>
    %517 = arith.mulf %516, %515 : vector<16x16xf32>
    %518 = arith.addf %512, %517 : vector<16x16xf32>
    %c84 = arith.constant 84 : index
    %519 = memref.load %arg1[%c84] : memref<98xf32, #tpu.memory_space<smem>>
    %c1_269 = arith.constant 1 : index
    %c5_270 = arith.constant 5 : index
    %c0_271 = arith.constant 0 : index
    %520 = vector.load %arg4[%c1_269, %c5_270, %c0_271] : memref<2x22x22xf32, #tpu.memory_space<vmem>>, vector<1x16x16xf32>
    %521 = vector.shape_cast %520 : vector<1x16x16xf32> to vector<16x16xf32>
    %522 = vector.broadcast %519 : f32 to vector<16x16xf32>
    %523 = arith.mulf %522, %521 : vector<16x16xf32>
    %524 = arith.addf %518, %523 : vector<16x16xf32>
    %c85 = arith.constant 85 : index
    %525 = memref.load %arg1[%c85] : memref<98xf32, #tpu.memory_space<smem>>
    %c1_272 = arith.constant 1 : index
    %c5_273 = arith.constant 5 : index
    %c1_274 = arith.constant 1 : index
    %526 = vector.load %arg4[%c1_272, %c5_273, %c1_274] : memref<2x22x22xf32, #tpu.memory_space<vmem>>, vector<1x16x16xf32>
    %527 = vector.shape_cast %526 : vector<1x16x16xf32> to vector<16x16xf32>
    %528 = vector.broadcast %525 : f32 to vector<16x16xf32>
    %529 = arith.mulf %528, %527 : vector<16x16xf32>
    %530 = arith.addf %524, %529 : vector<16x16xf32>
    %c86 = arith.constant 86 : index
    %531 = memref.load %arg1[%c86] : memref<98xf32, #tpu.memory_space<smem>>
    %c1_275 = arith.constant 1 : index
    %c5_276 = arith.constant 5 : index
    %c2_277 = arith.constant 2 : index
    %532 = vector.load %arg4[%c1_275, %c5_276, %c2_277] : memref<2x22x22xf32, #tpu.memory_space<vmem>>, vector<1x16x16xf32>
    %533 = vector.shape_cast %532 : vector<1x16x16xf32> to vector<16x16xf32>
    %534 = vector.broadcast %531 : f32 to vector<16x16xf32>
    %535 = arith.mulf %534, %533 : vector<16x16xf32>
    %536 = arith.addf %530, %535 : vector<16x16xf32>
    %c87 = arith.constant 87 : index
    %537 = memref.load %arg1[%c87] : memref<98xf32, #tpu.memory_space<smem>>
    %c1_278 = arith.constant 1 : index
    %c5_279 = arith.constant 5 : index
    %c3_280 = arith.constant 3 : index
    %538 = vector.load %arg4[%c1_278, %c5_279, %c3_280] : memref<2x22x22xf32, #tpu.memory_space<vmem>>, vector<1x16x16xf32>
    %539 = vector.shape_cast %538 : vector<1x16x16xf32> to vector<16x16xf32>
    %540 = vector.broadcast %537 : f32 to vector<16x16xf32>
    %541 = arith.mulf %540, %539 : vector<16x16xf32>
    %542 = arith.addf %536, %541 : vector<16x16xf32>
    %c88 = arith.constant 88 : index
    %543 = memref.load %arg1[%c88] : memref<98xf32, #tpu.memory_space<smem>>
    %c1_281 = arith.constant 1 : index
    %c5_282 = arith.constant 5 : index
    %c4_283 = arith.constant 4 : index
    %544 = vector.load %arg4[%c1_281, %c5_282, %c4_283] : memref<2x22x22xf32, #tpu.memory_space<vmem>>, vector<1x16x16xf32>
    %545 = vector.shape_cast %544 : vector<1x16x16xf32> to vector<16x16xf32>
    %546 = vector.broadcast %543 : f32 to vector<16x16xf32>
    %547 = arith.mulf %546, %545 : vector<16x16xf32>
    %548 = arith.addf %542, %547 : vector<16x16xf32>
    %c89 = arith.constant 89 : index
    %549 = memref.load %arg1[%c89] : memref<98xf32, #tpu.memory_space<smem>>
    %c1_284 = arith.constant 1 : index
    %c5_285 = arith.constant 5 : index
    %c5_286 = arith.constant 5 : index
    %550 = vector.load %arg4[%c1_284, %c5_285, %c5_286] : memref<2x22x22xf32, #tpu.memory_space<vmem>>, vector<1x16x16xf32>
    %551 = vector.shape_cast %550 : vector<1x16x16xf32> to vector<16x16xf32>
    %552 = vector.broadcast %549 : f32 to vector<16x16xf32>
    %553 = arith.mulf %552, %551 : vector<16x16xf32>
    %554 = arith.addf %548, %553 : vector<16x16xf32>
    %c90 = arith.constant 90 : index
    %555 = memref.load %arg1[%c90] : memref<98xf32, #tpu.memory_space<smem>>
    %c1_287 = arith.constant 1 : index
    %c5_288 = arith.constant 5 : index
    %c6_289 = arith.constant 6 : index
    %556 = vector.load %arg4[%c1_287, %c5_288, %c6_289] : memref<2x22x22xf32, #tpu.memory_space<vmem>>, vector<1x16x16xf32>
    %557 = vector.shape_cast %556 : vector<1x16x16xf32> to vector<16x16xf32>
    %558 = vector.broadcast %555 : f32 to vector<16x16xf32>
    %559 = arith.mulf %558, %557 : vector<16x16xf32>
    %560 = arith.addf %554, %559 : vector<16x16xf32>
    %c91 = arith.constant 91 : index
    %561 = memref.load %arg1[%c91] : memref<98xf32, #tpu.memory_space<smem>>
    %c1_290 = arith.constant 1 : index
    %c6_291 = arith.constant 6 : index
    %c0_292 = arith.constant 0 : index
    %562 = vector.load %arg4[%c1_290, %c6_291, %c0_292] : memref<2x22x22xf32, #tpu.memory_space<vmem>>, vector<1x16x16xf32>
    %563 = vector.shape_cast %562 : vector<1x16x16xf32> to vector<16x16xf32>
    %564 = vector.broadcast %561 : f32 to vector<16x16xf32>
    %565 = arith.mulf %564, %563 : vector<16x16xf32>
    %566 = arith.addf %560, %565 : vector<16x16xf32>
    %c92 = arith.constant 92 : index
    %567 = memref.load %arg1[%c92] : memref<98xf32, #tpu.memory_space<smem>>
    %c1_293 = arith.constant 1 : index
    %c6_294 = arith.constant 6 : index
    %c1_295 = arith.constant 1 : index
    %568 = vector.load %arg4[%c1_293, %c6_294, %c1_295] : memref<2x22x22xf32, #tpu.memory_space<vmem>>, vector<1x16x16xf32>
    %569 = vector.shape_cast %568 : vector<1x16x16xf32> to vector<16x16xf32>
    %570 = vector.broadcast %567 : f32 to vector<16x16xf32>
    %571 = arith.mulf %570, %569 : vector<16x16xf32>
    %572 = arith.addf %566, %571 : vector<16x16xf32>
    %c93 = arith.constant 93 : index
    %573 = memref.load %arg1[%c93] : memref<98xf32, #tpu.memory_space<smem>>
    %c1_296 = arith.constant 1 : index
    %c6_297 = arith.constant 6 : index
    %c2_298 = arith.constant 2 : index
    %574 = vector.load %arg4[%c1_296, %c6_297, %c2_298] : memref<2x22x22xf32, #tpu.memory_space<vmem>>, vector<1x16x16xf32>
    %575 = vector.shape_cast %574 : vector<1x16x16xf32> to vector<16x16xf32>
    %576 = vector.broadcast %573 : f32 to vector<16x16xf32>
    %577 = arith.mulf %576, %575 : vector<16x16xf32>
    %578 = arith.addf %572, %577 : vector<16x16xf32>
    %c94 = arith.constant 94 : index
    %579 = memref.load %arg1[%c94] : memref<98xf32, #tpu.memory_space<smem>>
    %c1_299 = arith.constant 1 : index
    %c6_300 = arith.constant 6 : index
    %c3_301 = arith.constant 3 : index
    %580 = vector.load %arg4[%c1_299, %c6_300, %c3_301] : memref<2x22x22xf32, #tpu.memory_space<vmem>>, vector<1x16x16xf32>
    %581 = vector.shape_cast %580 : vector<1x16x16xf32> to vector<16x16xf32>
    %582 = vector.broadcast %579 : f32 to vector<16x16xf32>
    %583 = arith.mulf %582, %581 : vector<16x16xf32>
    %584 = arith.addf %578, %583 : vector<16x16xf32>
    %c95 = arith.constant 95 : index
    %585 = memref.load %arg1[%c95] : memref<98xf32, #tpu.memory_space<smem>>
    %c1_302 = arith.constant 1 : index
    %c6_303 = arith.constant 6 : index
    %c4_304 = arith.constant 4 : index
    %586 = vector.load %arg4[%c1_302, %c6_303, %c4_304] : memref<2x22x22xf32, #tpu.memory_space<vmem>>, vector<1x16x16xf32>
    %587 = vector.shape_cast %586 : vector<1x16x16xf32> to vector<16x16xf32>
    %588 = vector.broadcast %585 : f32 to vector<16x16xf32>
    %589 = arith.mulf %588, %587 : vector<16x16xf32>
    %590 = arith.addf %584, %589 : vector<16x16xf32>
    %c96 = arith.constant 96 : index
    %591 = memref.load %arg1[%c96] : memref<98xf32, #tpu.memory_space<smem>>
    %c1_305 = arith.constant 1 : index
    %c6_306 = arith.constant 6 : index
    %c5_307 = arith.constant 5 : index
    %592 = vector.load %arg4[%c1_305, %c6_306, %c5_307] : memref<2x22x22xf32, #tpu.memory_space<vmem>>, vector<1x16x16xf32>
    %593 = vector.shape_cast %592 : vector<1x16x16xf32> to vector<16x16xf32>
    %594 = vector.broadcast %591 : f32 to vector<16x16xf32>
    %595 = arith.mulf %594, %593 : vector<16x16xf32>
    %596 = arith.addf %590, %595 : vector<16x16xf32>
    %c97 = arith.constant 97 : index
    %597 = memref.load %arg1[%c97] : memref<98xf32, #tpu.memory_space<smem>>
    %c1_308 = arith.constant 1 : index
    %c6_309 = arith.constant 6 : index
    %c6_310 = arith.constant 6 : index
    %598 = vector.load %arg4[%c1_308, %c6_309, %c6_310] : memref<2x22x22xf32, #tpu.memory_space<vmem>>, vector<1x16x16xf32>
    %599 = vector.shape_cast %598 : vector<1x16x16xf32> to vector<16x16xf32>
    %600 = vector.broadcast %597 : f32 to vector<16x16xf32>
    %601 = arith.mulf %600, %599 : vector<16x16xf32>
    %602 = arith.addf %596, %601 : vector<16x16xf32>
    %cst_311 = arith.constant 0.000000e+00 : f32
    %603 = vector.broadcast %cst_311 : f32 to vector<16x16xf32>
    %604 = arith.subf %603, %602 : vector<16x16xf32>
    %605 = math.exp %604 : vector<16x16xf32>
    %cst_312 = arith.constant 1.000000e+00 : f32
    %606 = vector.broadcast %cst_312 : f32 to vector<16x16xf32>
    %607 = arith.addf %606, %605 : vector<16x16xf32>
    %cst_313 = arith.constant 1.000000e+00 : f32
    %608 = vector.broadcast %cst_313 : f32 to vector<16x16xf32>
    %609 = arith.divf %608, %607 : vector<16x16xf32>
    %c0_i32 = arith.constant 0 : i32
    %c64_i32 = arith.constant 64 : i32
    %610 = arith.addi %c0_i32, %c64_i32 : i32
    %c1_i32_314 = arith.constant 1 : i32
    scf.for %arg5 = %c0_i32 to %610 step %c1_i32_314  : i32 {
      %c1_i32_316 = arith.constant 1 : i32
      %611 = arith.muli %arg5, %c1_i32_316 : i32
      %c0_i32_317 = arith.constant 0 : i32
      %612 = arith.addi %c0_i32_317, %611 : i32
      %c0_318 = arith.constant 0 : index
      %613 = arith.index_cast %612 : i32 to index
      %c0_319 = arith.constant 0 : index
      %c0_320 = arith.constant 0 : index
      %614 = vector.load %arg2[%c0_318, %613, %c0_319, %c0_320] : memref<1x64x16x16xf32, #tpu.memory_space<vmem>>, vector<1x1x16x16xf32>
      %615 = vector.shape_cast %614 : vector<1x1x16x16xf32> to vector<16x16xf32>
      %616 = arith.mulf %615, %609 : vector<16x16xf32>
      %c0_321 = arith.constant 0 : index
      %617 = arith.index_cast %612 : i32 to index
      %c0_322 = arith.constant 0 : index
      %c0_323 = arith.constant 0 : index
      %618 = vector.load %arg3[%c0_321, %617, %c0_322, %c0_323] : memref<1x64x16x16xf32, #tpu.memory_space<vmem>>, vector<1x1x16x16xf32>
      %619 = vector.shape_cast %618 : vector<1x1x16x16xf32> to vector<16x16xf32>
      %620 = vector.shape_cast %616 : vector<16x16xf32> to vector<1x1x16x16xf32>
      tpu.vector_store %arg3[%c0_321, %617, %c0_322, %c0_323], %620 {strides = array<i32>} : memref<1x64x16x16xf32, #tpu.memory_space<vmem>>, vector<1x1x16x16xf32>,
    }
    %c64_i32_315 = arith.constant 64 : i32
    return
  }
  func.func @transform_0(%arg0: i32) -> i32 {
    %c0_i32 = arith.constant 0 : i32
    %c0_i32_0 = arith.constant 0 : i32
    return %c0_i32 : i32
  }
  func.func @transform_1(%arg0: i32) -> (i32, i32, i32, i32) {
    %c0_i32 = arith.constant 0 : i32
    %c0_i32_0 = arith.constant 0 : i32
    %c0_i32_1 = arith.constant 0 : i32
    %c0_i32_2 = arith.constant 0 : i32
    return %arg0, %c0_i32, %c0_i32_0, %c0_i32_1 : i32, i32, i32, i32
  }
  func.func @transform_2(%arg0: i32) -> (i32, i32, i32, i32) {
    %c0_i32 = arith.constant 0 : i32
    %c0_i32_0 = arith.constant 0 : i32
    %c0_i32_1 = arith.constant 0 : i32
    %c0_i32_2 = arith.constant 0 : i32
    return %arg0, %c0_i32, %c0_i32_0, %c0_i32_1 : i32, i32, i32, i32
  }
}

</mosaic_0001>

<bundles_post_ra>
// kernel: spatial_attention.1
= control target key start
LH: loop header
LB: loop body
LE: loop exit
PB: predicated region body
PF: predicated region fallthrough
CT: control target
= control target key end

     0   :  { %7 = vsyncpa [#allocation4], 0  ;;  %s1943_s9 = smov 0   ;;  %s2606_s0 = inlined_call_operand.vmem [shape: f32[98], index: 0, kind: input, shape index: {}]   ;;  %s2607_s1 = inlined_call_operand.vmem [shape: f32[2,64,16,16], index: 1, kind: input, shape index: {}]   ;;  %s2608_s2 = inlined_call_operand.vmem [shape: f32[2,64,16,16], index: 2, kind: output, shape index: {}]  }
   0x1 LB: > { %s1647_s10 = sadd.s32 4294967295, %s1893_s9   ;;  %p1649_p0 = scmp.ge.s32.totalorder %s1893_s9, 1  ;;  %s1893_s9 = sphi %s1943_s9, %s13_s9  }
   0x2   : > { %p91_p1 = scmp.lt.s32.totalorder %s1893_s9, 3  ;;  %s103_s13 = sshll.u32 %s2606_s0, 4  ;;  %s104_s13 = int_to_ptr.vmem [resolvable:$true] %s103_s13 }
   0x3   : > { %p1769_p3 = scmp.eq.s32.totalorder %s1647_s10, 0  ;;  %s1919_s14 = smov [#allocation3]  }
   0x4   : > { %p92_p2 = pnand %p1649_p0, %p91_p1 }
   0x6   : > { %p1765_p4 = pneg %p92_p2  ;;  %124 = sbr.rel (%p92_p2) target bundleno = 750 (0x2ee), region = 28 }
   0x8   : > { %p1766_p5 = pnand %p1769_p3, %p1765_p4 }
   0xa   : > { %1768 = dma.vmem_to_smem (!%p1766_p5), %s104_s13, 16, %s1919_s14, [#allocation4]  }
   0xb   : > { %1888 = dma.done.wait (%p1769_p3), [#allocation4], 16  }
   0xc   : > { %1890 = vsyncadd (%p1769_p3), [#allocation4], 4294967280 }
   0xd   : > { %131 = sfence }
   0xe   : > { %p148_p6 = scmp.lt.s32.totalorder %s1647_s10, 1  ;;  %s1911_s22 = smov 1  }
  0x10   : > { %s2610_s10 = smov (!%p148_p6, %s1647_s10), 1 }
  0x11   : > { %s1759_s15 = sshll.u32 %s2610_s10, 10 }
  0x12   : > { %s1957_s18 = scalar_lea.vmem %s2607_s1, %s1759_s15  ;;  %s1962_s21 = scalar_lea.vmem %s2608_s2, %s1759_s15 }
  0x13   : > { %v158_v0 = vld [vmem:[%s1957_s18] sm:$0xff]   ;;  %v159_v1 = vld [vmem:[%s1957_s18 + $0x8] sm:$0xff]  }
  0x14   : > { %v1895_v2 = vmov %v159_v1   ;;  %v1899_v3 = vmov %v158_v0   ;;  %v1903_v4 = vmov %v159_v1   ;;  %v1907_v5 = vmov %v158_v0  }
  0x15 LB: >> { %s1658_s23 = sshll.u32 %s1913_s22, 4  ;;  %s165_s22 = sadd.s32 1, %s1913_s22   ;;  %s1913_s22 = sphi %s1911_s22, %s165_s22   ;;  %v1909_v5 = vphi %v1907_v5, %v1908_v5   ;;  %v1905_v4 = vphi %v1903_v4, %v1904_v4   ;;  %v1901_v3 = vphi %v1899_v3, %v1900_v3   ;;  %v1897_v2 = vphi %v1895_v2, %v1896_v2  }
  0x16   : >> { %s171_s24 = scalar_lea.vmem %s1957_s18, %s1658_s23  ;;  %p162_p7 = scmp.ge.s32.totalorder %s165_s22, 64  }
  0x17   : >> { %v172_v6 = vld [vmem:[%s171_s24] sm:$0xff]  ;;  %v173_v7 = vld [vmem:[%s171_s24 + $0x8] sm:$0xff]  ;;  %s1920_s25 = smov (%p162_p7), 3   ;;  %vm180_vm0 = vcmask (%p162_p7), 179200   ;;  %v1921_v13 = vmov (%p162_p7), 0.0   ;;  %vm183_vm1 = vcmask (%p162_p7), 177152  }
  0x18   : >> { %v174_v8 = vmax.f32 %v1909_v5, %v172_v6   ;;  %v175_v9 = vmax.f32 %v1905_v4, %v173_v7   ;;  %v176_v10 = vadd.f32 %v1901_v3, %v172_v6   ;;  %v177_v11 = vadd.f32 %v1897_v2, %v173_v7   ;;  %164 = sbr.rel (!%p162_p7) target bundleno = 21 (0x15), region = 81  ;;  %181 = vst.msk [vmem:[#allocation2] sm:$0xff] (%p162_p7), %vm180_vm0, %v1921_v13  ;;  %s1660_s26 = sld [smem:[#allocation3 + $0x2]] (%p162_p7) }
  0x19   : > { %182 = vst.msk [vmem:[#allocation2 + $0x8] sm:$0xff] (%p162_p7), %vm180_vm0, %v1921_v13  ;;  %vm196_vm2 = vcmask (%p162_p7), 154648   ;;  %s1659_s27 = sld [smem:[#allocation3 + $0x1]] (%p162_p7)  ;;  %s1922_s29 = smov (%p162_p7), 126  }
  0x1a   : >> { %v1896_v2 = vmov %v177_v11   ;;  %v1900_v3 = vmov %v176_v10   ;;  %v1904_v4 = vmov %v175_v9   ;;  %v1908_v5 = vmov %v174_v8   ;;  %190 = vrot.lane.b32.xlu0 (%p162_p7), %v174_v8, %s1920_s25  ;;  %185 = vst.msk [vmem:[#allocation2 + $0x18] sm:$0xff] (%p162_p7), %vm180_vm0, %v1921_v13  ;;  %s1661_s28 = sld [smem:[#allocation3 + $0x3]] (%p162_p7)  ;;  %s1923_s30 = smov (%p162_p7), 127  }
  0x1b   : > { %v178_v12 = vmul.f32 (%p162_p7), 0.015625, %v176_v10  ;;  %v179_v14 = vmul.f32 (%p162_p7), 0.015625, %v177_v11  ;;  %186 = vst.msk [vmem:[#allocation2 + $0x20] sm:$0xff] (%p162_p7), %vm180_vm0, %v1921_v13  ;;  %s1663_s3 = sld [smem:[#allocation3 + $0x5]] (%p162_p7)  ;;  %s1924_s5 = smov (%p162_p7), 125  }
  0x1c   : > { %184 = vst.msk [vmem:[#allocation2 + $0x10] sm:$0x3f] (%p162_p7), %vm183_vm1, %v1921_v13  ;;  %s1662_s4 = sld [smem:[#allocation3 + $0x4]] (%p162_p7)  ;;  %s1925_s7 = smov (%p162_p7), 123  }
  0x1d   : > { %201 = vrot.lane.b32.xlu1 %v178_v12, %s1920_s25  ;;  %187 = vst.msk [vmem:[#allocation2 + $0x28] sm:$0x3f] %vm183_vm1, %v1921_v13  ;;  %s1664_s6 = sld [smem:[#allocation3 + $0x6]]  ;;  %s1926_s8 = smov 124  }
  0x1e   : > { %v233_v16 = vstv %s1660_s26  ;;  %s1667_s10 = sld [smem:[#allocation3 + $0x9]]  ;;  %s1927_s12 = smov 122  }
  0x1f   : > { %v219_v17 = vstv %s1659_s27  ;;  %s1666_s11 = sld [smem:[#allocation3 + $0x8]] }
  0x20   : > { %v247_v23 = vstv %s1661_s28  ;;  %s1668_s13 = sld [smem:[#allocation3 + $0xa]] }
  0x21   : > { %v275_v27 = vstv %s1663_s3  ;;  %s1670_s14 = sld [smem:[#allocation3 + $0xc]] }
  0x22   : > { %192 = vrot.lane.b32.xlu0 %v175_v9, %s1920_s25  ;;  %v261_v28 = vstv %s1662_s4  ;;  %s1669_s15 = sld [smem:[#allocation3 + $0xb]] }
  0x23   : > { %v289_v32 = vstv %s1664_s6  ;;  %s1671_s16 = sld [smem:[#allocation3 + $0xd]] }
  0x24   : > { %v325_v37 = vstv %s1667_s10  ;;  %s1674_s17 = sld [smem:[#allocation3 + $0x10]] }
  0x25   : > { %203 = vrot.lane.b32.xlu1 %v179_v14, %s1920_s25  ;;  %v311_v38 = vstv %s1666_s11  ;;  %s1673_s19 = sld [smem:[#allocation3 + $0xf]] }
  0x26   : > { %v339_v43 = vstv %s1668_s13  ;;  %s1675_s20 = sld [smem:[#allocation3 + $0x11]] }
  0x27   : > { %v367_v47 = vstv %s1670_s14  ;;  %s1677_s22 = sld [smem:[#allocation3 + $0x13]] }
  0x28   : > { %v353_v48 = vstv %s1669_s15  ;;  %s1676_s23 = sld [smem:[#allocation3 + $0x12]] }
  0x29   : > { %v381_v52 = vstv %s1671_s16  ;;  %s1678_s24 = sld [smem:[#allocation3 + $0x14]] }
  0x2a   : > { %v417_v57 = vstv %s1674_s17  ;;  %s1681_s25 = sld [smem:[#allocation3 + $0x17]] }
  0x2b   : > { %v403_v58 = vstv %s1673_s19  ;;  %s1680_s26 = sld [smem:[#allocation3 + $0x16]] }
  0x2c   : > { %v431_v0 = vstv %s1675_s20  ;;  %s1682_s27 = sld [smem:[#allocation3 + $0x18]] }
  0x2d   : > { %v459_v4 = vstv %s1677_s22  ;;  %s1684_s28 = sld [smem:[#allocation3 + $0x1a]] }
  0x2e   : > { %v445_v6 = vstv %s1676_s23  ;;  %s1683_s3 = sld [smem:[#allocation3 + $0x19]] }
  0x2f   : > { %v473_v10 = vstv %s1678_s24  ;;  %s2069_s4 = sld [smem:[#allocation3 + $0x1b]] }
  0x30   : > { %s210_s6 = sld [smem:[#allocation3]] }
  0x31   : > { %s2077_s10 = sld [smem:[#allocation3 + $0x1e]] }
  0x32   : > { %s2079_s11 = sld [smem:[#allocation3 + $0x1d]] }
  0x33   : > { %s2092_s13 = sld [smem:[#allocation3 + $0x1f]] }
  0x34   : > { %s2095_s14 = sld [smem:[#allocation3 + $0x7]] }
  0x35   : > { %s2107_s15 = sld [smem:[#allocation3 + $0x21]] }
  0x36   : > { %s2109_s16 = sld [smem:[#allocation3 + $0x20]] }
  0x37   : > { %s2120_s17 = sld [smem:[#allocation3 + $0x22]] }
  0x38   : > { %s2131_s19 = sld [smem:[#allocation3 + $0x25]] }
  0x39   : > { %s2133_s20 = sld [smem:[#allocation3 + $0x24]] }
  0x3a   : > { %s2144_s22 = sld [smem:[#allocation3 + $0x26]] }
  0x3b   : > { %s2147_s23 = sld [smem:[#allocation3 + $0xe]] }
  0x3c   : > { %s2158_s24 = sld [smem:[#allocation3 + $0x28]] }
  0x8c   : > { %v191_v15 = vpop.permute.xlu0 %190 }
  0x8d   : > { %197 = vst.msk [vmem:[#allocation2 + $0x3] sm:$0xff] %vm196_vm2, %v191_v15 }
  0x8f   : > { %v202_v63 = vpop.permute.xlu1 %201 }
  0x90   : > { %208 = vst.msk [vmem:[#allocation2 + $0x1b] sm:$0xff] %vm196_vm2, %v202_v63 }
  0x94   : > { %v193_v18 = vpop.permute.xlu0 %192  ;;  %v1968_v19 = vld [vmem:[#allocation2] sm:$0xff] }
  0x95   : > { %198 = vst.msk [vmem:[#allocation2 + $0xb] sm:$0xff] %vm196_vm2, %v193_v18  ;;  %v234_v20 = vmul.f32 %v233_v16, %v1968_v19  ;;  %v220_v21 = vmul.f32 %v219_v17, %v1968_v19  ;;  %v276_v29 = vmul.f32 %v275_v27, %v1968_v19  ;;  %v248_v30 = vmul.f32 %v247_v23, %v1968_v19  ;;  %v1995_v36 = vld [vmem:[#allocation2 + $0x1] sm:$0xff] }
  0x96   : > { %v262_v31 = vmul.f32 %v261_v28, %v1968_v19  ;;  %v326_v39 = vmul.f32 %v325_v37, %v1995_v36  ;;  %v290_v40 = vmul.f32 %v289_v32, %v1968_v19  ;;  %v312_v41 = vmul.f32 %v311_v38, %v1995_v36  ;;  %v2023_v56 = vld [vmem:[#allocation2 + $0x2] sm:$0xff] }
  0x97   : > { %238 = vrot.lane.b32.xlu0 %v234_v20, %s1922_s29  ;;  %224 = vrot.lane.b32.xlu2 %v220_v21, %s1923_s30  ;;  %v368_v49 = vmul.f32 %v367_v47, %v1995_v36  ;;  %v340_v50 = vmul.f32 %v339_v43, %v1995_v36  ;;  %v354_v51 = vmul.f32 %v353_v48, %v1995_v36  ;;  %v204_v5 = vpop.permute.xlu1 %203  ;;  %v2053_v15 = vld [vmem:[#allocation2 + $0x3] sm:$0xff] }
  0x98   : > { %v418_v59 = vmul.f32 %v417_v57, %v2023_v56  ;;  %v382_v60 = vmul.f32 %v381_v52, %v1995_v36  ;;  %v404_v61 = vmul.f32 %v403_v58, %v2023_v56  ;;  %209 = vst.msk [vmem:[#allocation2 + $0x23] sm:$0xff] %vm196_vm2, %v204_v5  ;;  %v460_v7 = vmul.f32 %v459_v4, %v2023_v56 }
  0x99   : > { %v432_v8 = vmul.f32 %v431_v0, %v2023_v56  ;;  %v446_v9 = vmul.f32 %v445_v6, %v2023_v56  ;;  %v474_v20 = vmul.f32 %v473_v10, %v2023_v56 }
  0x9c   : > { %v1975_v22 = vld [vmem:[#allocation2 + $0x8] sm:$0xff] }
  0x9d   : > { %v221_v24 = vmul.f32 %v219_v17, %v1975_v22  ;;  %v249_v25 = vmul.f32 %v247_v23, %v1975_v22  ;;  %v235_v26 = vmul.f32 %v233_v16, %v1975_v22  ;;  %v291_v33 = vmul.f32 %v289_v32, %v1975_v22  ;;  %v2003_v42 = vld [vmem:[#allocation2 + $0x9] sm:$0xff] }
  0x9e   : > { %v263_v34 = vmul.f32 %v261_v28, %v1975_v22  ;;  %v277_v35 = vmul.f32 %v275_v27, %v1975_v22  ;;  %v341_v44 = vmul.f32 %v339_v43, %v2003_v42  ;;  %v313_v45 = vmul.f32 %v311_v38, %v2003_v42  ;;  %v2031_v62 = vld [vmem:[#allocation2 + $0xa] sm:$0xff] }
  0x9f   : > { %254 = vrot.lane.b32.xlu0 %v249_v25, %s1924_s5  ;;  %226 = vrot.lane.b32.xlu2 %v221_v24, %s1923_s30  ;;  %v327_v46 = vmul.f32 %v325_v37, %v2003_v42  ;;  %v383_v53 = vmul.f32 %v381_v52, %v2003_v42  ;;  %v355_v54 = vmul.f32 %v353_v48, %v2003_v42  ;;  %v509_v16 = vstv %s1681_s25  ;;  %v2061_v24 = vld [vmem:[#allocation2 + $0xb] sm:$0xff]  ;;  %s2160_s25 = sld [smem:[#allocation3 + $0x27]] }
  0xa0   : > { %240 = vrot.lane.b32.xlu1 %v235_v26, %s1922_s29  ;;  %v369_v55 = vmul.f32 %v367_v47, %v2003_v42  ;;  %v433_v1 = vmul.f32 %v431_v0, %v2031_v62  ;;  %v405_v2 = vmul.f32 %v403_v58, %v2031_v62  ;;  %v419_v3 = vmul.f32 %v417_v57, %v2031_v62  ;;  %v2089_v48 = vld [vmem:[#allocation2 + $0x4] sm:$0xff]  ;;  %v2104_v63 = vld [vmem:[#allocation2 + $0xc] sm:$0xff] }
  0xa1   : > { %v475_v11 = vmul.f32 %v473_v10, %v2031_v62  ;;  %v447_v12 = vmul.f32 %v445_v6, %v2031_v62  ;;  %v461_v13 = vmul.f32 %v459_v4, %v2031_v62  ;;  %v495_v17 = vstv %s1680_s26  ;;  %s2171_s26 = sld [smem:[#allocation3 + $0x29]] }
  0xa2   : > { %v510_v18 = vmul.f32 %v509_v16, %v2053_v15  ;;  %v496_v21 = vmul.f32 %v495_v17, %v2053_v15  ;;  %v523_v25 = vstv %s1682_s27  ;;  %v497_v27 = vmul.f32 %v495_v17, %v2061_v24  ;;  %s2182_s27 = sld [smem:[#allocation3 + $0x2c]] }
  0xa3   : > { %v525_v26 = vmul.f32 %v523_v25, %v2061_v24  ;;  %v511_v28 = vmul.f32 %v509_v16, %v2061_v24  ;;  %v565_v38 = vstv %s2069_s4  ;;  %v615_v0 = vstv %s2092_s13  ;;  %s2198_s4 = sld [smem:[#allocation3 + $0x15]] }
  0xa4   : > { %v617_v5 = vmul.f32 %v615_v0, %v2104_v63  ;;  %v643_v16 = vstv %s2107_s15  ;;  %s2233_s13 = sld [smem:[#allocation3 + $0x33]] }
  0xa5   : > { %s2246_s15 = sld [smem:[#allocation3 + $0x34]] }
  0xa7   : > { %280 = vrot.lane.b32.xlu0 %v276_v29, %s1925_s7  ;;  %252 = vrot.lane.b32.xlu2 %v248_v30, %s1924_s5  ;;  %v551_v30 = vstv %s1684_s28  ;;  %s2184_s28 = sld [smem:[#allocation3 + $0x2b]] }
  0xa8   : > { %266 = vrot.lane.b32.xlu1 %v262_v31, %s1926_s8  ;;  %v537_v31 = vstv %s1683_s3  ;;  %v552_v32 = vmul.f32 %v551_v30, %v2053_v15  ;;  %v553_v43 = vmul.f32 %v551_v30, %v2061_v24  ;;  %v657_v30 = vstv %s2120_s17  ;;  %s2195_s3 = sld [smem:[#allocation3 + $0x2d]] }
  0xa9   : > { %s2260_s17 = sld [smem:[#allocation3 + $0x36]] }
  0xaf   : > { %296 = vrot.lane.b32.xlu0 %v291_v33, %s1927_s12  ;;  %268 = vrot.lane.b32.xlu2 %v263_v34, %s1926_s8  ;;  %v524_v33 = vmul.f32 %v523_v25, %v2053_v15  ;;  %v538_v34 = vmul.f32 %v537_v31, %v2053_v15 }
  0xb0   : > { %282 = vrot.lane.b32.xlu1 %v277_v35, %s1925_s7 }
  0xb7   : > { %330 = vrot.lane.b32.xlu0 %v326_v39, %s1922_s29  ;;  %294 = vrot.lane.b32.xlu2 %v290_v40, %s1927_s12  ;;  %v567_v39 = vmul.f32 %v565_v38, %v2061_v24  ;;  %v539_v40 = vmul.f32 %v537_v31, %v2061_v24 }
  0xb8   : > { %316 = vrot.lane.b32.xlu1 %v312_v41, %s1923_s30  ;;  %v213_v41 = vstv %s210_s6  ;;  %s2209_s6 = sld [smem:[#allocation3 + $0x2f]] }
  0xb9   : > { %v215_v52 = vmul.f32 %v213_v41, %v1975_v22 }
  0xbf   : > { %346 = vrot.lane.b32.xlu0 %v341_v44, %s1924_s5  ;;  %318 = vrot.lane.b32.xlu2 %v313_v45, %s1923_s30  ;;  %v214_v44 = vmul.f32 %v213_v41, %v1968_v19  ;;  %v566_v19 = vmul.f32 %v565_v38, %v2053_v15  ;;  %v2141_v38 = vld [vmem:[#allocation2 + $0x5] sm:$0xff] }
  0xc0   : > { %332 = vrot.lane.b32.xlu1 %v327_v46, %s1922_s29 }
  0xc7   : > { %372 = vrot.lane.b32.xlu0 %v368_v49, %s1925_s7  ;;  %344 = vrot.lane.b32.xlu2 %v340_v50, %s1924_s5  ;;  %v601_v49 = vstv %s2077_s10  ;;  %s2211_s10 = sld [smem:[#allocation3 + $0x2e]] }
  0xc8   : > { %358 = vrot.lane.b32.xlu1 %v354_v51, %s1926_s8  ;;  %v587_v51 = vstv %s2079_s11  ;;  %s2222_s11 = sld [smem:[#allocation3 + $0x30]] }
  0xc9   : > { %v589_v6 = vmul.f32 %v587_v51, %v2104_v63 }
  0xcf   : > { %388 = vrot.lane.b32.xlu0 %v383_v53, %s1927_s12  ;;  %360 = vrot.lane.b32.xlu2 %v355_v54, %s1926_s8  ;;  %v602_v54 = vmul.f32 %v601_v49, %v2089_v48 }
  0xd0   : > { %374 = vrot.lane.b32.xlu1 %v369_v55, %s1925_s7  ;;  %v588_v55 = vmul.f32 %v587_v51, %v2089_v48 }
  0xd7   : > { %422 = vrot.lane.b32.xlu0 %v418_v59, %s1922_s29  ;;  %386 = vrot.lane.b32.xlu2 %v382_v60, %s1927_s12 }
  0xd8   : > { %408 = vrot.lane.b32.xlu1 %v404_v61, %s1923_s30 }
  0xdf   : > { %438 = vrot.lane.b32.xlu0 %v433_v1, %s1924_s5  ;;  %410 = vrot.lane.b32.xlu2 %v405_v2, %s1923_s30  ;;  %v305_v2 = vstv %s2095_s14  ;;  %s2235_s14 = sld [smem:[#allocation3 + $0x32]] }
  0xe0   : > { %424 = vrot.lane.b32.xlu1 %v419_v3, %s1922_s29 }
  0xe7   : > { %464 = vrot.lane.b32.xlu0 %v460_v7, %s1925_s7  ;;  %436 = vrot.lane.b32.xlu2 %v432_v8, %s1924_s5  ;;  %v603_v7 = vmul.f32 %v601_v49, %v2104_v63 }
  0xe8   : > { %450 = vrot.lane.b32.xlu1 %v446_v9, %s1926_s8  ;;  %v306_v9 = vmul.f32 %v305_v2, %v1995_v36  ;;  %v307_v36 = vmul.f32 %v305_v2, %v2003_v42  ;;  %v659_v42 = vmul.f32 %v657_v30, %v2104_v63 }
  0xef   : > { %480 = vrot.lane.b32.xlu0 %v475_v11, %s1927_s12  ;;  %452 = vrot.lane.b32.xlu2 %v447_v12, %s1926_s8 }
  0xf0   : > { %466 = vrot.lane.b32.xlu1 %v461_v13, %s1925_s7 }
  0xf1   : > { %v225_v14 = vpop.permute.xlu2 %224 }
  0xf2   : > { %v230_v50 = vadd.f32 %v225_v14, %v214_v44  ;;  %v658_v44 = vmul.f32 %v657_v30, %v2089_v48  ;;  %v2192_v30 = vld [vmem:[#allocation2 + $0x6] sm:$0xff] }
  0xf7   : > { %514 = vrot.lane.b32.xlu0 %v510_v18, %s1922_s29  ;;  %478 = vrot.lane.b32.xlu2 %v474_v20, %s1927_s12  ;;  %v629_v18 = vstv %s2109_s16  ;;  %s2249_s16 = sld [smem:[#allocation3 + $0x1c]] }
  0xf8   : > { %500 = vrot.lane.b32.xlu1 %v496_v21, %s1923_s30  ;;  %v644_v21 = vmul.f32 %v643_v16, %v2089_v48  ;;  %v630_v25 = vmul.f32 %v629_v18, %v2089_v48  ;;  %v631_v31 = vmul.f32 %v629_v18, %v2104_v63 }
  0xf9   : > { %v227_v23 = vpop.permute.xlu2 %226 }
  0xfa   : > { %v231_v57 = vadd.f32 %v227_v23, %v215_v52  ;;  %v616_v23 = vmul.f32 %v615_v0, %v2089_v48 }
  0xff   : > { %530 = vrot.lane.b32.xlu0 %v525_v26, %s1924_s5  ;;  %502 = vrot.lane.b32.xlu2 %v497_v27, %s1923_s30 }
 0x100   : > { %516 = vrot.lane.b32.xlu1 %v511_v28, %s1922_s29 }
 0x101   : > { %v253_v29 = vpop.permute.xlu2 %252 }
 0x107   : > { %556 = vrot.lane.b32.xlu0 %v552_v32, %s1925_s7  ;;  %528 = vrot.lane.b32.xlu2 %v524_v33, %s1924_s5  ;;  %v645_v32 = vmul.f32 %v643_v16, %v2104_v63 }
 0x108   : > { %542 = vrot.lane.b32.xlu1 %v538_v34, %s1926_s8 }
 0x109   : > { %v239_v35 = vpop.permute.xlu0 %238  ;;  %v269_v37 = vpop.permute.xlu2 %268 }
 0x10a   : > { %v244_v53 = vadd.f32 %v239_v35, %v230_v50 }
 0x10c   : > { %v258_v61 = vadd.f32 %v253_v29, %v244_v53  ;;  %v2155_v53 = vld [vmem:[#allocation2 + $0xd] sm:$0xff] }
 0x10f   : > { %572 = vrot.lane.b32.xlu0 %v567_v39, %s1927_s12  ;;  %544 = vrot.lane.b32.xlu2 %v539_v40, %s1926_s8  ;;  %v693_v39 = vstv %s2131_s19  ;;  %v679_v40 = vstv %s2133_s20  ;;  %s2262_s19 = sld [smem:[#allocation3 + $0x35]] }
 0x110   : > { %558 = vrot.lane.b32.xlu1 %v553_v43, %s1925_s7  ;;  %v694_v43 = vmul.f32 %v693_v39, %v2141_v38  ;;  %s2273_s20 = sld [smem:[#allocation3 + $0x37]] }
 0x111   : > { %v255_v45 = vpop.permute.xlu0 %254  ;;  %v295_v46 = vpop.permute.xlu2 %294 }
 0x112   : > { %v241_v47 = vpop.permute.xlu1 %240 }
 0x113   : > { %v245_v58 = vadd.f32 %v241_v47, %v231_v57 }
 0x115   : > { %v259_v3 = vadd.f32 %v255_v45, %v245_v58  ;;  %v680_v45 = vmul.f32 %v679_v40, %v2141_v38 }
 0x117   : > { %606 = vrot.lane.b32.xlu0 %v602_v54, %s1922_s29  ;;  %570 = vrot.lane.b32.xlu2 %v566_v19, %s1927_s12  ;;  %v273_v12 = vadd.f32 %v269_v37, %v259_v3  ;;  %v707_v54 = vstv %s2144_s22  ;;  %s2284_s22 = sld [smem:[#allocation3 + $0x3a]] }
 0x118   : > { %592 = vrot.lane.b32.xlu1 %v588_v55, %s1923_s30  ;;  %v397_v55 = vstv %s2147_s23  ;;  %s2286_s23 = sld [smem:[#allocation3 + $0x39]] }
 0x119   : > { %v281_v59 = vpop.permute.xlu0 %280  ;;  %v319_v60 = vpop.permute.xlu2 %318  ;;  %v398_v0 = vmul.f32 %v397_v55, %v2023_v56  ;;  %v399_v56 = vmul.f32 %v397_v55, %v2031_v62 }
 0x11a   : > { %v267_v22 = vpop.permute.xlu1 %266 }
 0x11b   : > { %v272_v1 = vadd.f32 %v267_v22, %v258_v61  ;;  %v695_v61 = vmul.f32 %v693_v39, %v2155_v53 }
 0x11d   : > { %v286_v4 = vadd.f32 %v281_v59, %v272_v1  ;;  %v709_v59 = vmul.f32 %v707_v54, %v2155_v53 }
 0x11f   : > { %622 = vrot.lane.b32.xlu0 %v617_v5, %s1924_s5  ;;  %594 = vrot.lane.b32.xlu2 %v589_v6, %s1923_s30  ;;  %v300_v8 = vadd.f32 %v295_v46, %v286_v4  ;;  %v735_v6 = vstv %s2158_s24  ;;  %s2297_s24 = sld [smem:[#allocation3 + $0x3b]] }
 0x120   : > { %608 = vrot.lane.b32.xlu1 %v603_v7, %s1922_s29 }
 0x121   : > { %v297_v10 = vpop.permute.xlu0 %296  ;;  %v345_v11 = vpop.permute.xlu2 %344  ;;  %v308_v13 = vadd.f32 %v306_v9, %v300_v8  ;;  %v721_v8 = vstv %s2160_s25  ;;  %s2300_s25 = sld [smem:[#allocation3 + $0x23]] }
 0x122   : > { %v283_v14 = vpop.permute.xlu1 %282 }
 0x123   : > { %v287_v17 = vadd.f32 %v283_v14, %v273_v12  ;;  %v722_v12 = vmul.f32 %v721_v8, %v2141_v38 }
 0x125   : > { %v301_v20 = vadd.f32 %v297_v10, %v287_v17  ;;  %v736_v10 = vmul.f32 %v735_v6, %v2141_v38 }
 0x127   : > { %648 = vrot.lane.b32.xlu0 %v644_v21, %s1925_s7  ;;  %620 = vrot.lane.b32.xlu2 %v616_v23, %s1924_s5  ;;  %v309_v26 = vadd.f32 %v307_v36, %v301_v20  ;;  %v749_v20 = vstv %s2171_s26  ;;  %v723_v36 = vmul.f32 %v721_v8, %v2155_v53  ;;  %s2311_s26 = sld [smem:[#allocation3 + $0x3d]] }
 0x128   : > { %634 = vrot.lane.b32.xlu1 %v630_v25, %s1926_s8  ;;  %v751_v23 = vmul.f32 %v749_v20, %v2155_v53  ;;  %v737_v25 = vmul.f32 %v735_v6, %v2155_v53 }
 0x129   : > { %v331_v27 = vpop.permute.xlu0 %330  ;;  %v361_v28 = vpop.permute.xlu2 %360  ;;  %v323_v46 = vadd.f32 %v319_v60, %v309_v26  ;;  %v681_v60 = vmul.f32 %v679_v40, %v2155_v53 }
 0x12a   : > { %v317_v29 = vpop.permute.xlu1 %316 }
 0x12b   : > { %v322_v33 = vadd.f32 %v317_v29, %v308_v13 }
 0x12d   : > { %v336_v41 = vadd.f32 %v331_v27, %v322_v33 }
 0x12f   : > { %664 = vrot.lane.b32.xlu0 %v659_v42, %s1927_s12  ;;  %636 = vrot.lane.b32.xlu2 %v631_v31, %s1926_s8  ;;  %v350_v51 = vadd.f32 %v345_v11, %v336_v41  ;;  %v708_v11 = vmul.f32 %v707_v54, %v2141_v38  ;;  %v785_v42 = vstv %s2182_s27  ;;  %s2313_s27 = sld [smem:[#allocation3 + $0x3c]] }
 0x130   : > { %650 = vrot.lane.b32.xlu1 %v645_v32, %s1925_s7  ;;  %v771_v32 = vstv %s2184_s28  ;;  %s2324_s28 = sld [smem:[#allocation3 + $0x3e]] }
 0x131   : > { %v347_v34 = vpop.permute.xlu0 %346  ;;  %v387_v35 = vpop.permute.xlu2 %386 }
 0x132   : > { %v333_v37 = vpop.permute.xlu1 %332 }
 0x133   : > { %v337_v47 = vadd.f32 %v333_v37, %v323_v46  ;;  %v772_v37 = vmul.f32 %v771_v32, %v2192_v30 }
 0x135   : > { %v351_v57 = vadd.f32 %v347_v34, %v337_v47  ;;  %v786_v34 = vmul.f32 %v785_v42, %v2192_v30  ;;  %v489_v47 = vstv %s2198_s4  ;;  %s2337_s4 = sld [smem:[#allocation3 + $0x40]] }
 0x137   : > { %698 = vrot.lane.b32.xlu0 %v694_v43, %s1922_s29  ;;  %662 = vrot.lane.b32.xlu2 %v658_v44, %s1927_s12  ;;  %v365_v3 = vadd.f32 %v361_v28, %v351_v57  ;;  %v2206_v44 = vld [vmem:[#allocation2 + $0xe] sm:$0xff] }
 0x138   : > { %684 = vrot.lane.b32.xlu1 %v680_v45, %s1923_s30  ;;  %v799_v45 = vstv %s2195_s3  ;;  %s2335_s3 = sld [smem:[#allocation3 + $0x41]] }
 0x139   : > { %v373_v49 = vpop.permute.xlu0 %372  ;;  %v411_v50 = vpop.permute.xlu2 %410 }
 0x13a   : > { %v359_v52 = vpop.permute.xlu1 %358 }
 0x13b   : > { %v364_v19 = vadd.f32 %v359_v52, %v350_v51  ;;  %v773_v51 = vmul.f32 %v771_v32, %v2206_v44  ;;  %v787_v52 = vmul.f32 %v785_v42, %v2206_v44  ;;  %v891_v32 = vstv %s2246_s15  ;;  %s2386_s15 = sld [smem:[#allocation3 + $0x48]] }
 0x13d   : > { %v378_v58 = vadd.f32 %v373_v49, %v364_v19  ;;  %v490_v19 = vmul.f32 %v489_v47, %v2053_v15 }
 0x13f   : > { %714 = vrot.lane.b32.xlu0 %v709_v59, %s1924_s5  ;;  %686 = vrot.lane.b32.xlu2 %v681_v60, %s1923_s30  ;;  %v392_v22 = vadd.f32 %v387_v35, %v378_v58  ;;  %v750_v35 = vmul.f32 %v749_v20, %v2141_v38  ;;  %v827_v60 = vstv %s2209_s6  ;;  %v877_v20 = vstv %s2233_s13  ;;  %s2348_s6 = sld [smem:[#allocation3 + $0x42]] }
 0x140   : > { %700 = vrot.lane.b32.xlu1 %v695_v61, %s1922_s29  ;;  %s2364_s13 = sld [smem:[#allocation3 + $0x43]] }
 0x141   : > { %v389_v1 = vpop.permute.xlu0 %388  ;;  %v437_v2 = vpop.permute.xlu2 %436  ;;  %v400_v4 = vadd.f32 %v398_v0, %v392_v22  ;;  %v813_v22 = vstv %s2211_s10  ;;  %s2351_s10 = sld [smem:[#allocation3 + $0x2a]] }
 0x142   : > { %v375_v5 = vpop.permute.xlu1 %374  ;;  %v814_v15 = vmul.f32 %v813_v22, %v2192_v30 }
 0x143   : > { %v379_v7 = vadd.f32 %v375_v5, %v365_v3  ;;  %v491_v3 = vmul.f32 %v489_v47, %v2061_v24 }
 0x145   : > { %v393_v9 = vadd.f32 %v389_v1, %v379_v7  ;;  %v828_v1 = vmul.f32 %v827_v60, %v2192_v30 }
 0x147   : > { %740 = vrot.lane.b32.xlu0 %v736_v10, %s1925_s7  ;;  %712 = vrot.lane.b32.xlu2 %v708_v11, %s1924_s5  ;;  %v401_v13 = vadd.f32 %v399_v56, %v393_v9  ;;  %v841_v9 = vstv %s2222_s11  ;;  %v815_v56 = vmul.f32 %v813_v22, %v2206_v44  ;;  %s2362_s11 = sld [smem:[#allocation3 + $0x44]] }
 0x148   : > { %726 = vrot.lane.b32.xlu1 %v722_v12, %s1926_s8  ;;  %v843_v11 = vmul.f32 %v841_v9, %v2206_v44  ;;  %v829_v12 = vmul.f32 %v827_v60, %v2206_v44 }
 0x149   : > { %v423_v14 = vpop.permute.xlu0 %422  ;;  %v453_v16 = vpop.permute.xlu2 %452  ;;  %v415_v17 = vadd.f32 %v411_v50, %v401_v13  ;;  %v801_v50 = vmul.f32 %v799_v45, %v2206_v44 }
 0x14a   : > { %v409_v18 = vpop.permute.xlu1 %408 }
 0x14b   : > { %v414_v21 = vadd.f32 %v409_v18, %v400_v4  ;;  %v2243_v18 = vld [vmem:[#allocation2 + $0x18] sm:$0xff] }
 0x14d   : > { %v428_v62 = vadd.f32 %v423_v14, %v414_v21 }
 0x14f   : > { %756 = vrot.lane.b32.xlu0 %v751_v23, %s1927_s12  ;;  %728 = vrot.lane.b32.xlu2 %v723_v36, %s1926_s8  ;;  %v442_v26 = vadd.f32 %v437_v2, %v428_v62  ;;  %v800_v2 = vmul.f32 %v799_v45, %v2192_v30  ;;  %v863_v62 = vstv %s2235_s14  ;;  %v842_v36 = vmul.f32 %v841_v9, %v2192_v30  ;;  %s2375_s14 = sld [smem:[#allocation3 + $0x45]] }
 0x150   : > { %742 = vrot.lane.b32.xlu1 %v737_v25, %s1925_s7  ;;  %v878_v25 = vmul.f32 %v877_v20, %v2243_v18  ;;  %v969_v9 = vstv %s2284_s22  ;;  %s2414_s22 = sld [smem:[#allocation3 + $0x4a]] }
 0x151   : > { %v439_v27 = vpop.permute.xlu0 %438  ;;  %v479_v28 = vpop.permute.xlu2 %478 }
 0x152   : > { %v425_v29 = vpop.permute.xlu1 %424 }
 0x153   : > { %v429_v31 = vadd.f32 %v425_v29, %v415_v17 }
 0x155   : > { %v443_v33 = vadd.f32 %v439_v27, %v429_v31  ;;  %v2257_v31 = vld [vmem:[#allocation2 + $0x20] sm:$0xff] }
 0x157   : > { %790 = vrot.lane.b32.xlu0 %v786_v34, %s1922_s29  ;;  %754 = vrot.lane.b32.xlu2 %v750_v35, %s1927_s12  ;;  %v457_v39 = vadd.f32 %v453_v16, %v443_v33  ;;  %v581_v34 = vstv %s2249_s16  ;;  %s2388_s16 = sld [smem:[#allocation3 + $0x47]] }
 0x158   : > { %776 = vrot.lane.b32.xlu1 %v772_v37, %s1923_s30  ;;  %v893_v37 = vmul.f32 %v891_v32, %v2257_v31 }
 0x159   : > { %v465_v40 = vpop.permute.xlu0 %464  ;;  %v503_v41 = vpop.permute.xlu2 %502 }
 0x15a   : > { %v451_v43 = vpop.permute.xlu1 %450 }
 0x15b   : > { %v456_v46 = vadd.f32 %v451_v43, %v442_v26  ;;  %v864_v26 = vmul.f32 %v863_v62, %v2243_v18  ;;  %v582_v43 = vmul.f32 %v581_v34, %v2089_v48 }
 0x15d   : > { %v470_v49 = vadd.f32 %v465_v40, %v456_v46  ;;  %v879_v40 = vmul.f32 %v877_v20, %v2257_v31 }
 0x15f   : > { %806 = vrot.lane.b32.xlu0 %v801_v50, %s1924_s5  ;;  %778 = vrot.lane.b32.xlu2 %v773_v51, %s1923_s30  ;;  %v484_v54 = vadd.f32 %v479_v28, %v470_v49  ;;  %v919_v50 = vstv %s2260_s17  ;;  %s2400_s17 = sld [smem:[#allocation3 + $0x49]] }
 0x160   : > { %792 = vrot.lane.b32.xlu1 %v787_v52, %s1922_s29  ;;  %v905_v52 = vstv %s2262_s19  ;;  %s2402_s19 = sld [smem:[#allocation3 + $0x31]] }
 0x161   : > { %v481_v55 = vpop.permute.xlu0 %480  ;;  %v529_v57 = vpop.permute.xlu2 %528  ;;  %v492_v58 = vadd.f32 %v490_v19, %v484_v54  ;;  %v920_v19 = vmul.f32 %v919_v50, %v2243_v18  ;;  %v906_v48 = vmul.f32 %v905_v52, %v2243_v18 }
 0x162   : > { %v467_v59 = vpop.permute.xlu1 %466 }
 0x163   : > { %v471_v61 = vadd.f32 %v467_v59, %v457_v39  ;;  %v865_v39 = vmul.f32 %v863_v62, %v2257_v31  ;;  %v983_v62 = vstv %s2297_s24  ;;  %s2436_s24 = sld [smem:[#allocation3 + $0x4f]] }
 0x165   : > { %v485_v0 = vadd.f32 %v481_v55, %v471_v61  ;;  %v892_v55 = vmul.f32 %v891_v32, %v2243_v18 }
 0x167   : > { %832 = vrot.lane.b32.xlu0 %v828_v1, %s1925_s7  ;;  %804 = vrot.lane.b32.xlu2 %v800_v2, %s1924_s5  ;;  %v493_v4 = vadd.f32 %v491_v3, %v485_v0  ;;  %v933_v0 = vstv %s2273_s20  ;;  %v907_v3 = vmul.f32 %v905_v52, %v2257_v31  ;;  %s2412_s20 = sld [smem:[#allocation3 + $0x4b]] }
 0x168   : > { %818 = vrot.lane.b32.xlu1 %v814_v15, %s1926_s8  ;;  %v935_v2 = vmul.f32 %v933_v0, %v2257_v31  ;;  %v921_v15 = vmul.f32 %v919_v50, %v2257_v31 }
 0x169   : > { %v515_v5 = vpop.permute.xlu0 %514  ;;  %v545_v6 = vpop.permute.xlu2 %544  ;;  %v507_v7 = vadd.f32 %v503_v41, %v493_v4 }
 0x16a   : > { %v501_v8 = vpop.permute.xlu1 %500 }
 0x16b   : > { %v506_v10 = vadd.f32 %v501_v8, %v492_v58  ;;  %v2294_v8 = vld [vmem:[#allocation2 + $0x19] sm:$0xff] }
 0x16d   : > { %v520_v24 = vadd.f32 %v515_v5, %v506_v10 }
 0x16f   : > { %848 = vrot.lane.b32.xlu0 %v843_v11, %s1927_s12  ;;  %820 = vrot.lane.b32.xlu2 %v815_v56, %s1926_s8  ;;  %v534_v13 = vadd.f32 %v529_v57, %v520_v24  ;;  %v583_v57 = vmul.f32 %v581_v34, %v2104_v63  ;;  %v955_v24 = vstv %s2286_s23  ;;  %v970_v56 = vmul.f32 %v969_v9, %v2294_v8  ;;  %s2427_s23 = sld [smem:[#allocation3 + $0x4c]] }
 0x170   : > { %834 = vrot.lane.b32.xlu1 %v829_v12, %s1925_s7  ;;  %v934_v12 = vmul.f32 %v933_v0, %v2243_v18  ;;  %v1061_v0 = vstv %s2335_s3  ;;  %s2465_s3 = sld [smem:[#allocation3 + $0x51]] }
 0x171   : > { %v531_v14 = vpop.permute.xlu0 %530  ;;  %v571_v16 = vpop.permute.xlu2 %570 }
 0x172   : > { %v517_v17 = vpop.permute.xlu1 %516 }
 0x173   : > { %v521_v21 = vadd.f32 %v517_v17, %v507_v7 }
 0x175   : > { %v535_v23 = vadd.f32 %v531_v14, %v521_v21  ;;  %v2308_v21 = vld [vmem:[#allocation2 + $0x21] sm:$0xff] }
 0x177   : > { %846 = vrot.lane.b32.xlu2 %v842_v36, %s1927_s12  ;;  %882 = vrot.lane.b32.xlu0 %v878_v25, %s1922_s29  ;;  %v549_v27 = vadd.f32 %v545_v6, %v535_v23  ;;  %v673_v36 = vstv %s2300_s25  ;;  %s2438_s25 = sld [smem:[#allocation3 + $0x4e]] }
 0x178   : > { %868 = vrot.lane.b32.xlu1 %v864_v26, %s1923_s30  ;;  %v985_v26 = vmul.f32 %v983_v62, %v2308_v21 }
 0x179   : > { %v557_v28 = vpop.permute.xlu0 %556  ;;  %v595_v29 = vpop.permute.xlu2 %594 }
 0x17a   : > { %v543_v42 = vpop.permute.xlu1 %542 }
 0x17b   : > { %v548_v33 = vadd.f32 %v543_v42, %v534_v13  ;;  %v956_v13 = vmul.f32 %v955_v24, %v2294_v8  ;;  %v674_v42 = vmul.f32 %v673_v36, %v2141_v38 }
 0x17d   : > { %v562_v35 = vadd.f32 %v557_v28, %v548_v33  ;;  %v971_v28 = vmul.f32 %v969_v9, %v2308_v21 }
 0x17f   : > { %898 = vrot.lane.b32.xlu0 %v893_v37, %s1924_s5  ;;  %870 = vrot.lane.b32.xlu2 %v865_v39, %s1923_s30  ;;  %v576_v41 = vadd.f32 %v571_v16, %v562_v35  ;;  %v1011_v37 = vstv %s2311_s26  ;;  %s2451_s26 = sld [smem:[#allocation3 + $0x50]] }
 0x180   : > { %884 = vrot.lane.b32.xlu1 %v879_v40, %s1922_s29  ;;  %v997_v40 = vstv %s2313_s27  ;;  %s2453_s27 = sld [smem:[#allocation3 + $0x38]] }
 0x181   : > { %v573_v45 = vpop.permute.xlu0 %572  ;;  %v621_v46 = vpop.permute.xlu2 %620  ;;  %v584_v47 = vadd.f32 %v582_v43, %v576_v41  ;;  %v1012_v43 = vmul.f32 %v1011_v37, %v2294_v8  ;;  %v998_v38 = vmul.f32 %v997_v40, %v2294_v8 }
 0x182   : > { %v559_v49 = vpop.permute.xlu1 %558 }
 0x183   : > { %v563_v51 = vadd.f32 %v559_v49, %v549_v27  ;;  %v957_v27 = vmul.f32 %v955_v24, %v2308_v21  ;;  %v1075_v24 = vstv %s2348_s6  ;;  %s2487_s6 = sld [smem:[#allocation3 + $0x56]] }
 0x185   : > { %v577_v54 = vadd.f32 %v573_v45, %v563_v51  ;;  %v984_v45 = vmul.f32 %v983_v62, %v2294_v8 }
 0x187   : > { %924 = vrot.lane.b32.xlu0 %v920_v19, %s1925_s7  ;;  %896 = vrot.lane.b32.xlu2 %v892_v55, %s1924_s5  ;;  %v585_v58 = vadd.f32 %v583_v57, %v577_v54  ;;  %v1025_v54 = vstv %s2324_s28  ;;  %v999_v57 = vmul.f32 %v997_v40, %v2308_v21  ;;  %s2463_s28 = sld [smem:[#allocation3 + $0x52]] }
 0x188   : > { %910 = vrot.lane.b32.xlu1 %v906_v48, %s1926_s8  ;;  %v1027_v55 = vmul.f32 %v1025_v54, %v2308_v21  ;;  %v1013_v48 = vmul.f32 %v1011_v37, %v2308_v21 }
 0x189   : > { %v607_v59 = vpop.permute.xlu0 %606  ;;  %v637_v60 = vpop.permute.xlu2 %636  ;;  %v599_v61 = vadd.f32 %v595_v29, %v585_v58 }
 0x18a   : > { %v593_v22 = vpop.permute.xlu1 %592 }
 0x18b   : > { %v598_v1 = vadd.f32 %v593_v22, %v584_v47  ;;  %v2345_v22 = vld [vmem:[#allocation2 + $0x1a] sm:$0xff] }
 0x18d   : > { %v612_v63 = vadd.f32 %v607_v59, %v598_v1 }
 0x18f   : > { %940 = vrot.lane.b32.xlu0 %v935_v2, %s1927_s12  ;;  %912 = vrot.lane.b32.xlu2 %v907_v3, %s1926_s8  ;;  %v626_v4 = vadd.f32 %v621_v46, %v612_v63  ;;  %v675_v46 = vmul.f32 %v673_v36, %v2155_v53  ;;  %v1047_v63 = vstv %s2337_s4  ;;  %v1062_v3 = vmul.f32 %v1061_v0, %v2345_v22  ;;  %s2478_s4 = sld [smem:[#allocation3 + $0x53]] }
 0x190   : > { %926 = vrot.lane.b32.xlu1 %v921_v15, %s1925_s7  ;;  %v1026_v15 = vmul.f32 %v1025_v54, %v2294_v8  ;;  %v1153_v54 = vstv %s2386_s15  ;;  %s2516_s15 = sld [smem:[#allocation3 + $0x58]] }
 0x191   : > { %v623_v5 = vpop.permute.xlu0 %622  ;;  %v663_v6 = vpop.permute.xlu2 %662 }
 0x192   : > { %v609_v7 = vpop.permute.xlu1 %608 }
 0x193   : > { %v613_v10 = vadd.f32 %v609_v7, %v599_v61 }
 0x195   : > { %v627_v11 = vadd.f32 %v623_v5, %v613_v10  ;;  %v2359_v10 = vld [vmem:[#allocation2 + $0x22] sm:$0xff] }
 0x197   : > { %974 = vrot.lane.b32.xlu0 %v970_v56, %s1922_s29  ;;  %938 = vrot.lane.b32.xlu2 %v934_v12, %s1927_s12  ;;  %v641_v14 = vadd.f32 %v637_v60, %v627_v11  ;;  %v765_v56 = vstv %s2351_s10  ;;  %s2489_s10 = sld [smem:[#allocation3 + $0x55]] }
 0x198   : > { %960 = vrot.lane.b32.xlu1 %v956_v13, %s1923_s30  ;;  %v1077_v13 = vmul.f32 %v1075_v24, %v2359_v10 }
 0x199   : > { %v649_v16 = vpop.permute.xlu0 %648  ;;  %v687_v17 = vpop.permute.xlu2 %686 }
 0x19a   : > { %v635_v20 = vpop.permute.xlu1 %634 }
 0x19b   : > { %v640_v23 = vadd.f32 %v635_v20, %v626_v4  ;;  %v1048_v4 = vmul.f32 %v1047_v63, %v2345_v22  ;;  %v766_v20 = vmul.f32 %v765_v56, %v2192_v30 }
 0x19d   : > { %v654_v25 = vadd.f32 %v649_v16, %v640_v23  ;;  %v1063_v16 = vmul.f32 %v1061_v0, %v2359_v10 }
 0x19f   : > { %990 = vrot.lane.b32.xlu0 %v985_v26, %s1924_s5  ;;  %962 = vrot.lane.b32.xlu2 %v957_v27, %s1923_s30  ;;  %v668_v29 = vadd.f32 %v663_v6, %v654_v25  ;;  %v1103_v26 = vstv %s2362_s11  ;;  %s2502_s11 = sld [smem:[#allocation3 + $0x57]] }
 0x1a0   : > { %976 = vrot.lane.b32.xlu1 %v971_v28, %s1922_s29  ;;  %v1089_v28 = vstv %s2364_s13  ;;  %s2504_s13 = sld [smem:[#allocation3 + $0x3f]] }
 0x1a1   : > { %v665_v32 = vpop.permute.xlu0 %664  ;;  %v713_v33 = vpop.permute.xlu2 %712  ;;  %v676_v34 = vadd.f32 %v674_v42, %v668_v29  ;;  %v1104_v42 = vmul.f32 %v1103_v26, %v2345_v22  ;;  %v1090_v30 = vmul.f32 %v1089_v28, %v2345_v22 }
 0x1a2   : > { %v651_v35 = vpop.permute.xlu1 %650 }
 0x1a3   : > { %v655_v39 = vadd.f32 %v651_v35, %v641_v14  ;;  %v1049_v14 = vmul.f32 %v1047_v63, %v2359_v10 }
 0x1a5   : > { %v669_v41 = vadd.f32 %v665_v32, %v655_v39  ;;  %v1076_v32 = vmul.f32 %v1075_v24, %v2345_v22 }
 0x1a7   : > { %1016 = vrot.lane.b32.xlu0 %v1012_v43, %s1925_s7  ;;  %988 = vrot.lane.b32.xlu2 %v984_v45, %s1924_s5  ;;  %v677_v47 = vadd.f32 %v675_v46, %v669_v41  ;;  %v1117_v41 = vstv %s2375_s14  ;;  %v1091_v46 = vmul.f32 %v1089_v28, %v2359_v10  ;;  %s2514_s14 = sld [smem:[#allocation3 + $0x59]] }
 0x1a8   : > { %1002 = vrot.lane.b32.xlu1 %v998_v38, %s1926_s8  ;;  %v1119_v45 = vmul.f32 %v1117_v41, %v2359_v10  ;;  %v1105_v38 = vmul.f32 %v1103_v26, %v2359_v10 }
 0x1a9   : > { %v699_v49 = vpop.permute.xlu0 %698  ;;  %v729_v50 = vpop.permute.xlu2 %728  ;;  %v691_v51 = vadd.f32 %v687_v17, %v677_v47 }
 0x1aa   : > { %v685_v52 = vpop.permute.xlu1 %684 }
 0x1ab   : > { %v690_v19 = vadd.f32 %v685_v52, %v676_v34  ;;  %v2396_v52 = vld [vmem:[#allocation2 + $0x1b] sm:$0xff] }
 0x1ad   : > { %v704_v53 = vadd.f32 %v699_v49, %v690_v19 }
 0x1af   : > { %1032 = vrot.lane.b32.xlu0 %v1027_v55, %s1927_s12  ;;  %1004 = vrot.lane.b32.xlu2 %v999_v57, %s1926_s8  ;;  %v718_v58 = vadd.f32 %v713_v33, %v704_v53  ;;  %v767_v33 = vmul.f32 %v765_v56, %v2206_v44  ;;  %v1139_v53 = vstv %s2388_s16  ;;  %v1154_v57 = vmul.f32 %v1153_v54, %v2396_v52  ;;  %s2529_s16 = sld [smem:[#allocation3 + $0x5a]] }
 0x1b0   : > { %1018 = vrot.lane.b32.xlu1 %v1013_v48, %s1925_s7  ;;  %v1118_v48 = vmul.f32 %v1117_v41, %v2345_v22  ;;  %v1245_v41 = vstv %s2436_s24  ;;  %s2567_s24 = sld [smem:[#allocation3 + $0x5f]] }
 0x1b1   : > { %v715_v59 = vpop.permute.xlu0 %714  ;;  %v755_v60 = vpop.permute.xlu2 %754 }
 0x1b2   : > { %v701_v61 = vpop.permute.xlu1 %700 }
 0x1b3   : > { %v705_v1 = vadd.f32 %v701_v61, %v691_v51 }
 0x1b5   : > { %v719_v2 = vadd.f32 %v715_v59, %v705_v1  ;;  %v2410_v1 = vld [vmem:[#allocation2 + $0x23] sm:$0xff] }
 0x1b7   : > { %1066 = vrot.lane.b32.xlu0 %v1062_v3, %s1922_s29  ;;  %1030 = vrot.lane.b32.xlu2 %v1026_v15, %s1927_s12  ;;  %v733_v5 = vadd.f32 %v729_v50, %v719_v2  ;;  %v1167_v2 = vstv %s2400_s17  ;;  %v857_v3 = vstv %s2402_s19  ;;  %s2538_s17 = sld [smem:[#allocation3 + $0x5d]] }
 0x1b8   : > { %1052 = vrot.lane.b32.xlu1 %v1048_v4, %s1923_s30  ;;  %v1169_v4 = vmul.f32 %v1167_v2, %v2410_v1  ;;  %s2540_s19 = sld [smem:[#allocation3 + $0x5c]] }
 0x1b9   : > { %v741_v6 = vpop.permute.xlu0 %740  ;;  %v779_v7 = vpop.permute.xlu2 %778 }
 0x1ba   : > { %v727_v9 = vpop.permute.xlu1 %726 }
 0x1bb   : > { %v732_v11 = vadd.f32 %v727_v9, %v718_v58  ;;  %v1140_v58 = vmul.f32 %v1139_v53, %v2396_v52  ;;  %v858_v9 = vmul.f32 %v857_v3, %v2243_v18 }
 0x1bd   : > { %v746_v12 = vadd.f32 %v741_v6, %v732_v11  ;;  %v1155_v6 = vmul.f32 %v1153_v54, %v2410_v1 }
 0x1bf   : > { %1082 = vrot.lane.b32.xlu0 %v1077_v13, %s1924_s5  ;;  %1054 = vrot.lane.b32.xlu2 %v1049_v14, %s1923_s30  ;;  %v760_v17 = vadd.f32 %v755_v60, %v746_v12  ;;  %v1195_v13 = vstv %s2412_s20  ;;  %s2553_s20 = sld [smem:[#allocation3 + $0x5e]] }
 0x1c0   : > { %1068 = vrot.lane.b32.xlu1 %v1063_v16, %s1922_s29  ;;  %v1181_v16 = vstv %s2414_s22  ;;  %s2555_s22 = sld [smem:[#allocation3 + $0x46]] }
 0x1c1   : > { %v757_v62 = vpop.permute.xlu0 %756  ;;  %v805_v23 = vpop.permute.xlu2 %804  ;;  %v768_v36 = vadd.f32 %v766_v20, %v760_v17  ;;  %v1196_v20 = vmul.f32 %v1195_v13, %v2396_v52  ;;  %v1182_v18 = vmul.f32 %v1181_v16, %v2396_v52 }
 0x1c2   : > { %v743_v25 = vpop.permute.xlu1 %742 }
 0x1c3   : > { %v747_v27 = vadd.f32 %v743_v25, %v733_v5  ;;  %v1141_v5 = vmul.f32 %v1139_v53, %v2410_v1 }
 0x1c5   : > { %v761_v29 = vadd.f32 %v757_v62, %v747_v27  ;;  %v1168_v62 = vmul.f32 %v1167_v2, %v2396_v52 }
 0x1c7   : > { %1108 = vrot.lane.b32.xlu0 %v1104_v42, %s1925_s7  ;;  %1080 = vrot.lane.b32.xlu2 %v1076_v32, %s1924_s5  ;;  %v769_v34 = vadd.f32 %v767_v33, %v761_v29  ;;  %v1183_v33 = vmul.f32 %v1181_v16, %v2410_v1 }
 0x1c8   : > { %1094 = vrot.lane.b32.xlu1 %v1090_v30, %s1926_s8  ;;  %v1197_v30 = vmul.f32 %v1195_v13, %v2410_v1 }
 0x1c9   : > { %v791_v35 = vpop.permute.xlu0 %790  ;;  %v821_v37 = vpop.permute.xlu2 %820  ;;  %v783_v39 = vadd.f32 %v779_v7, %v769_v34 }
 0x1ca   : > { %v777_v40 = vpop.permute.xlu1 %776 }
 0x1cb   : > { %v782_v43 = vadd.f32 %v777_v40, %v768_v36  ;;  %v2447_v40 = vld [vmem:[#allocation2 + $0x1c] sm:$0xff] }
 0x1cd   : > { %v796_v44 = vadd.f32 %v791_v35, %v782_v43 }
 0x1cf   : > { %1124 = vrot.lane.b32.xlu0 %v1119_v45, %s1927_s12  ;;  %1096 = vrot.lane.b32.xlu2 %v1091_v46, %s1926_s8  ;;  %v810_v47 = vadd.f32 %v805_v23, %v796_v44  ;;  %v859_v23 = vmul.f32 %v857_v3, %v2257_v31  ;;  %v1209_v31 = vstv %s2427_s23  ;;  %v1231_v44 = vstv %s2438_s25  ;;  %s2565_s23 = sld [smem:[#allocation3 + $0x60]] }
 0x1d0   : > { %1110 = vrot.lane.b32.xlu1 %v1105_v38, %s1925_s7  ;;  %v1211_v32 = vmul.f32 %v1209_v31, %v2410_v1  ;;  %v1246_v46 = vmul.f32 %v1245_v41, %v2447_v40  ;;  %v1210_v38 = vmul.f32 %v1209_v31, %v2396_v52  ;;  %s1755_s25 = sld [smem:[#allocation3 + $0x61]] }
 0x1d1   : > { %v807_v49 = vpop.permute.xlu0 %806  ;;  %v847_v50 = vpop.permute.xlu2 %846 }
 0x1d2   : > { %v793_v51 = vpop.permute.xlu1 %792 }
 0x1d3   : > { %v797_v19 = vadd.f32 %v793_v51, %v783_v39 }
 0x1d5   : > { %v811_v55 = vadd.f32 %v807_v49, %v797_v19  ;;  %v2461_v19 = vld [vmem:[#allocation2 + $0x24] sm:$0xff] }
 0x1d7   : > { %1158 = vrot.lane.b32.xlu0 %v1154_v57, %s1922_s29  ;;  %1122 = vrot.lane.b32.xlu2 %v1118_v48, %s1927_s12  ;;  %v825_v59 = vadd.f32 %v821_v37, %v811_v55  ;;  %v1259_v55 = vstv %s2451_s26  ;;  %v949_v57 = vstv %s2453_s27 }
 0x1d8   : > { %1144 = vrot.lane.b32.xlu1 %v1140_v58, %s1923_s30  ;;  %v1261_v58 = vmul.f32 %v1259_v55, %v2461_v19 }
 0x1d9   : > { %v833_v60 = vpop.permute.xlu0 %832  ;;  %v871_v61 = vpop.permute.xlu2 %870 }
 0x1da   : > { %v819_v0 = vpop.permute.xlu1 %818 }
 0x1db   : > { %v824_v63 = vadd.f32 %v819_v0, %v810_v47  ;;  %v1232_v47 = vmul.f32 %v1231_v44, %v2447_v40  ;;  %v950_v0 = vmul.f32 %v949_v57, %v2294_v8 }
 0x1dd   : > { %v838_v15 = vadd.f32 %v833_v60, %v824_v63  ;;  %v1247_v60 = vmul.f32 %v1245_v41, %v2461_v19 }
 0x1df   : > { %1174 = vrot.lane.b32.xlu0 %v1169_v4, %s1924_s5  ;;  %1146 = vrot.lane.b32.xlu2 %v1141_v5, %s1923_s30  ;;  %v852_v7 = vadd.f32 %v847_v50, %v838_v15  ;;  %v1287_v4 = vstv %s2463_s28 }
 0x1e0   : > { %1160 = vrot.lane.b32.xlu1 %v1155_v6, %s1922_s29  ;;  %v1273_v6 = vstv %s2465_s3 }
 0x1e1   : > { %v849_v24 = vpop.permute.xlu0 %848  ;;  %v897_v11 = vpop.permute.xlu2 %896  ;;  %v860_v56 = vadd.f32 %v858_v9, %v852_v7  ;;  %v1288_v9 = vmul.f32 %v1287_v4, %v2447_v40  ;;  %v1274_v8 = vmul.f32 %v1273_v6, %v2447_v40 }
 0x1e2   : > { %v835_v12 = vpop.permute.xlu1 %834 }
 0x1e3   : > { %v839_v14 = vadd.f32 %v835_v12, %v825_v59  ;;  %v1233_v59 = vmul.f32 %v1231_v44, %v2461_v19 }
 0x1e5   : > { %v853_v17 = vadd.f32 %v849_v24, %v839_v14  ;;  %v1260_v24 = vmul.f32 %v1259_v55, %v2447_v40 }
 0x1e7   : > { %1200 = vrot.lane.b32.xlu0 %v1196_v20, %s1925_s7  ;;  %1172 = vrot.lane.b32.xlu2 %v1168_v62, %s1924_s5  ;;  %v861_v36 = vadd.f32 %v859_v23, %v853_v17  ;;  %v1275_v23 = vmul.f32 %v1273_v6, %v2461_v19 }
 0x1e8   : > { %1186 = vrot.lane.b32.xlu1 %v1182_v18, %s1926_s8  ;;  %v1289_v18 = vmul.f32 %v1287_v4, %v2461_v19 }
 0x1e9   : > { %v883_v25 = vpop.permute.xlu0 %882  ;;  %v913_v26 = vpop.permute.xlu2 %912  ;;  %v875_v27 = vadd.f32 %v871_v61, %v861_v36 }
 0x1ea   : > { %v869_v28 = vpop.permute.xlu1 %868 }
 0x1eb   : > { %v874_v29 = vadd.f32 %v869_v28, %v860_v56  ;;  %v2498_v28 = vld [vmem:[#allocation2 + $0x1d] sm:$0xff] }
 0x1ed   : > { %v888_v42 = vadd.f32 %v883_v25, %v874_v29  ;;  %v1337_v29 = vstv %s2487_s6 }
 0x1ef   : > { %1216 = vrot.lane.b32.xlu0 %v1211_v32, %s1927_s12  ;;  %1188 = vrot.lane.b32.xlu2 %v1183_v33, %s1926_s8  ;;  %v902_v34 = vadd.f32 %v897_v11, %v888_v42  ;;  %v951_v11 = vmul.f32 %v949_v57, %v2308_v21  ;;  %v1301_v21 = vstv %s2478_s4  ;;  %v1323_v42 = vstv %s2489_s10 }
 0x1f0   : > { %1202 = vrot.lane.b32.xlu1 %v1197_v30, %s1925_s7  ;;  %v1303_v62 = vmul.f32 %v1301_v21, %v2461_v19  ;;  %v1338_v33 = vmul.f32 %v1337_v29, %v2498_v28  ;;  %v1302_v30 = vmul.f32 %v1301_v21, %v2447_v40 }
 0x1f1   : > { %v899_v35 = vpop.permute.xlu0 %898  ;;  %v939_v37 = vpop.permute.xlu2 %938 }
 0x1f2   : > { %v885_v39 = vpop.permute.xlu1 %884 }
 0x1f3   : > { %v889_v43 = vadd.f32 %v885_v39, %v875_v27 }
 0x1f5   : > { %v903_v45 = vadd.f32 %v899_v35, %v889_v43  ;;  %v2512_v43 = vld [vmem:[#allocation2 + $0x25] sm:$0xff] }
 0x1f7   : > { %1250 = vrot.lane.b32.xlu0 %v1246_v46, %s1922_s29  ;;  %1214 = vrot.lane.b32.xlu2 %v1210_v38, %s1927_s12  ;;  %v917_v49 = vadd.f32 %v913_v26, %v903_v45  ;;  %v1351_v45 = vstv %s2502_s11  ;;  %v1041_v46 = vstv %s2504_s13 }
 0x1f8   : > { %1236 = vrot.lane.b32.xlu1 %v1232_v47, %s1923_s30  ;;  %v1353_v47 = vmul.f32 %v1351_v45, %v2512_v43 }
 0x1f9   : > { %v925_v50 = vpop.permute.xlu0 %924  ;;  %v963_v51 = vpop.permute.xlu2 %962 }
 0x1fa   : > { %v911_v54 = vpop.permute.xlu1 %910 }
 0x1fb   : > { %v916_v53 = vadd.f32 %v911_v54, %v902_v34  ;;  %v1324_v34 = vmul.f32 %v1323_v42, %v2498_v28  ;;  %v1042_v54 = vmul.f32 %v1041_v46, %v2345_v22 }
 0x1fd   : > { %v930_v48 = vadd.f32 %v925_v50, %v916_v53  ;;  %v1339_v50 = vmul.f32 %v1337_v29, %v2512_v43 }
 0x1ff   : > { %1266 = vrot.lane.b32.xlu0 %v1261_v58, %s1924_s5  ;;  %1238 = vrot.lane.b32.xlu2 %v1233_v59, %s1923_s30  ;;  %v944_v61 = vadd.f32 %v939_v37, %v930_v48  ;;  %v1379_v58 = vstv %s2514_s14 }
 0x200   : > { %1252 = vrot.lane.b32.xlu1 %v1247_v60, %s1922_s29  ;;  %v1365_v60 = vstv %s2516_s15 }
 0x201   : > { %v941_v63 = vpop.permute.xlu0 %940  ;;  %v989_v2 = vpop.permute.xlu2 %988  ;;  %v952_v3 = vadd.f32 %v950_v0, %v944_v61  ;;  %v1380_v0 = vmul.f32 %v1379_v58, %v2498_v28  ;;  %v1366_v22 = vmul.f32 %v1365_v60, %v2498_v28 }
 0x202   : > { %v927_v15 = vpop.permute.xlu1 %926 }
 0x203   : > { %v931_v5 = vadd.f32 %v927_v15, %v917_v49  ;;  %v1325_v49 = vmul.f32 %v1323_v42, %v2512_v43 }
 0x205   : > { %v945_v7 = vadd.f32 %v941_v63, %v931_v5  ;;  %v1352_v63 = vmul.f32 %v1351_v45, %v2498_v28 }
 0x207   : > { %1292 = vrot.lane.b32.xlu0 %v1288_v9, %s1925_s7  ;;  %1264 = vrot.lane.b32.xlu2 %v1260_v24, %s1924_s5  ;;  %v953_v56 = vadd.f32 %v951_v11, %v945_v7  ;;  %v1367_v11 = vmul.f32 %v1365_v60, %v2512_v43 }
 0x208   : > { %1278 = vrot.lane.b32.xlu1 %v1274_v8, %s1926_s8  ;;  %v1381_v8 = vmul.f32 %v1379_v58, %v2512_v43 }
 0x209   : > { %v975_v12 = vpop.permute.xlu0 %974  ;;  %v1005_v13 = vpop.permute.xlu2 %1004  ;;  %v967_v14 = vadd.f32 %v963_v51, %v953_v56 }
 0x20a   : > { %v961_v16 = vpop.permute.xlu1 %960 }
 0x20b   : > { %v966_v17 = vadd.f32 %v961_v16, %v952_v3  ;;  %v2549_v16 = vld [vmem:[#allocation2 + $0x1e] sm:$0xff] }
 0x20d   : > { %v980_v20 = vadd.f32 %v975_v12, %v966_v17  ;;  %v1429_v17 = vstv %s2538_s17 }
 0x20f   : > { %1308 = vrot.lane.b32.xlu0 %v1303_v62, %s1927_s12  ;;  %1280 = vrot.lane.b32.xlu2 %v1275_v23, %s1926_s8  ;;  %v994_v36 = vadd.f32 %v989_v2, %v980_v20  ;;  %v1043_v2 = vmul.f32 %v1041_v46, %v2359_v10  ;;  %v1393_v10 = vstv %s2529_s16  ;;  %v1415_v20 = vstv %s2540_s19 }
 0x210   : > { %1294 = vrot.lane.b32.xlu1 %v1289_v18, %s1925_s7  ;;  %v1395_v24 = vmul.f32 %v1393_v10, %v2512_v43  ;;  %v1430_v23 = vmul.f32 %v1429_v17, %v2549_v16  ;;  %v1394_v18 = vmul.f32 %v1393_v10, %v2498_v28 }
 0x211   : > { %v991_v25 = vpop.permute.xlu0 %990  ;;  %v1031_v26 = vpop.permute.xlu2 %1030 }
 0x212   : > { %v977_v27 = vpop.permute.xlu1 %976 }
 0x213   : > { %v981_v31 = vadd.f32 %v977_v27, %v967_v14 }
 0x215   : > { %v995_v32 = vadd.f32 %v991_v25, %v981_v31  ;;  %v2563_v31 = vld [vmem:[#allocation2 + $0x26] sm:$0xff] }
 0x217   : > { %1342 = vrot.lane.b32.xlu0 %v1338_v33, %s1922_s29  ;;  %1306 = vrot.lane.b32.xlu2 %v1302_v30, %s1927_s12  ;;  %v1009_v35 = vadd.f32 %v1005_v13, %v995_v32  ;;  %v1443_v32 = vstv %s2553_s20  ;;  %v1133_v33 = vstv %s2555_s22 }
 0x218   : > { %1328 = vrot.lane.b32.xlu1 %v1324_v34, %s1923_s30  ;;  %v1445_v34 = vmul.f32 %v1443_v32, %v2563_v31 }
 0x219   : > { %v1017_v37 = vpop.permute.xlu0 %1016  ;;  %v1055_v39 = vpop.permute.xlu2 %1054 }
 0x21a   : > { %v1003_v41 = vpop.permute.xlu1 %1002 }
 0x21b   : > { %v1008_v44 = vadd.f32 %v1003_v41, %v994_v36  ;;  %v1416_v36 = vmul.f32 %v1415_v20, %v2549_v16  ;;  %v1134_v41 = vmul.f32 %v1133_v33, %v2396_v52 }
 0x21d   : > { %v1022_v38 = vadd.f32 %v1017_v37, %v1008_v44  ;;  %v1431_v37 = vmul.f32 %v1429_v17, %v2563_v31 }
 0x21f   : > { %1358 = vrot.lane.b32.xlu0 %v1353_v47, %s1924_s5  ;;  %1330 = vrot.lane.b32.xlu2 %v1325_v49, %s1923_s30  ;;  %v1036_v51 = vadd.f32 %v1031_v26, %v1022_v38  ;;  %v1471_v47 = vstv %s2565_s23 }
 0x220   : > { %1344 = vrot.lane.b32.xlu1 %v1339_v50, %s1922_s29  ;;  %v1457_v50 = vstv %s2567_s24 }
 0x221   : > { %v1033_v53 = vpop.permute.xlu0 %1032  ;;  %v1081_v55 = vpop.permute.xlu2 %1080  ;;  %v1044_v57 = vadd.f32 %v1042_v54, %v1036_v51  ;;  %v1472_v54 = vmul.f32 %v1471_v47, %v2549_v16 }
 0x222   : > { %v1019_v48 = vpop.permute.xlu1 %1018 }
 0x223   : > { %v1023_v59 = vadd.f32 %v1019_v48, %v1009_v35  ;;  %v1417_v35 = vmul.f32 %v1415_v20, %v2563_v31 }
 0x225   : > { %v1037_v61 = vadd.f32 %v1033_v53, %v1023_v59  ;;  %v1444_v53 = vmul.f32 %v1443_v32, %v2549_v16 }
 0x227   : > { %1384 = vrot.lane.b32.xlu0 %v1380_v0, %s1925_s7  ;;  %1356 = vrot.lane.b32.xlu2 %v1352_v63, %s1924_s5  ;;  %v1045_v3 = vadd.f32 %v1043_v2, %v1037_v61  ;;  %v1485_v0 = vstv %s1755_s25 }
 0x228   : > { %1370 = vrot.lane.b32.xlu1 %v1366_v22, %s1926_s8  ;;  %v1487_v2 = vmul.f32 %v1485_v0, %v2563_v31  ;;  %v1473_v22 = vmul.f32 %v1471_v47, %v2563_v31  ;;  %v1486_v10 = vmul.f32 %v1485_v0, %v2549_v16 }
 0x229   : > { %v1067_v15 = vpop.permute.xlu0 %1066  ;;  %v1097_v4 = vpop.permute.xlu2 %1096  ;;  %v1059_v5 = vadd.f32 %v1055_v39, %v1045_v3 }
 0x22a   : > { %v1053_v6 = vpop.permute.xlu1 %1052 }
 0x22b   : > { %v1058_v7 = vadd.f32 %v1053_v6, %v1044_v57  ;;  %v1458_v57 = vmul.f32 %v1457_v50, %v2549_v16 }
 0x22d   : > { %v1072_v9 = vadd.f32 %v1067_v15, %v1058_v7 }
 0x22f   : > { %1400 = vrot.lane.b32.xlu0 %v1395_v24, %s1927_s12  ;;  %1372 = vrot.lane.b32.xlu2 %v1367_v11, %s1926_s8  ;;  %v1086_v56 = vadd.f32 %v1081_v55, %v1072_v9  ;;  %v1135_v55 = vmul.f32 %v1133_v33, %v2410_v1  ;;  %v1459_v1 = vmul.f32 %v1457_v50, %v2563_v31 }
 0x230   : > { %1386 = vrot.lane.b32.xlu1 %v1381_v8, %s1925_s7 }
 0x231   : > { %v1083_v12 = vpop.permute.xlu0 %1082  ;;  %v1123_v13 = vpop.permute.xlu2 %1122 }
 0x232   : > { %v1069_v14 = vpop.permute.xlu1 %1068 }
 0x233   : > { %v1073_v21 = vadd.f32 %v1069_v14, %v1059_v5 }
 0x235   : > { %v1087_v62 = vadd.f32 %v1083_v12, %v1073_v21 }
 0x237   : > { %1434 = vrot.lane.b32.xlu0 %v1430_v23, %s1922_s29  ;;  %1398 = vrot.lane.b32.xlu2 %v1394_v18, %s1927_s12  ;;  %v1101_v25 = vadd.f32 %v1097_v4, %v1087_v62 }
 0x238   : > { %1420 = vrot.lane.b32.xlu1 %v1416_v36, %s1923_s30 }
 0x239   : > { %v1109_v26 = vpop.permute.xlu0 %1108  ;;  %v1147_v27 = vpop.permute.xlu2 %1146 }
 0x23a   : > { %v1095_v29 = vpop.permute.xlu1 %1094 }
 0x23b   : > { %v1100_v42 = vadd.f32 %v1095_v29, %v1086_v56 }
 0x23d   : > { %v1114_v30 = vadd.f32 %v1109_v26, %v1100_v42 }
 0x23f   : > { %1450 = vrot.lane.b32.xlu0 %v1445_v34, %s1924_s5  ;;  %1422 = vrot.lane.b32.xlu2 %v1417_v35, %s1923_s30  ;;  %v1128_v39 = vadd.f32 %v1123_v13, %v1114_v30  ;;  %s1742_s30 = sld [smem:[#allocation3 + $0x54]] }
 0x240   : > { %1436 = vrot.lane.b32.xlu1 %v1431_v37, %s1922_s29  ;;  %s1735_s29 = sld [smem:[#allocation3 + $0x4d]] }
 0x241   : > { %v1125_v44 = vpop.permute.xlu0 %1124  ;;  %v1173_v45 = vpop.permute.xlu2 %1172  ;;  %v1136_v46 = vadd.f32 %v1134_v41, %v1128_v39 }
 0x242   : > { %v1111_v38 = vpop.permute.xlu1 %1110 }
 0x243   : > { %v1115_v49 = vadd.f32 %v1111_v38, %v1101_v25 }
 0x245   : > { %v1129_v51 = vadd.f32 %v1125_v44, %v1115_v49  ;;  %v1317_v38 = vstv %s1742_s30 }
 0x246   : > { %v1225_v56 = vstv %s1735_s29  ;;  %v1318_v50 = vmul.f32 %v1317_v38, %v2498_v28 }
 0x247   : > { %1476 = vrot.lane.b32.xlu0 %v1472_v54, %s1925_s7  ;;  %1448 = vrot.lane.b32.xlu2 %v1444_v53, %s1924_s5  ;;  %v1137_v52 = vadd.f32 %v1135_v55, %v1129_v51  ;;  %v1226_v14 = vmul.f32 %v1225_v56, %v2447_v40  ;;  %v1227_v25 = vmul.f32 %v1225_v56, %v2461_v19  ;;  %s1749_s5 = sld [smem:[#allocation3 + $0x5b]] }
 0x248   : > { %1462 = vrot.lane.b32.xlu1 %v1458_v57, %s1926_s8 }
 0x249   : > { %v1159_v48 = vpop.permute.xlu0 %1158  ;;  %v1189_v58 = vpop.permute.xlu2 %1188  ;;  %v1151_v59 = vadd.f32 %v1147_v27, %v1137_v52 }
 0x24a   : > { %v1145_v60 = vpop.permute.xlu1 %1144 }
 0x24b   : > { %v1150_v61 = vadd.f32 %v1145_v60, %v1136_v46 }
 0x24d   : > { %v1164_v63 = vadd.f32 %v1159_v48, %v1150_v61 }
 0x24f   : > { %1492 = vrot.lane.b32.xlu0 %v1487_v2, %s1927_s12  ;;  %1464 = vrot.lane.b32.xlu2 %v1459_v1, %s1926_s8  ;;  %v1178_v3 = vadd.f32 %v1173_v45, %v1164_v63 }
 0x250   : > { %1478 = vrot.lane.b32.xlu1 %v1473_v22, %s1925_s7  ;;  %s1915_s7 = smov 0  }
 0x251   : > { %v1175_v15 = vpop.permute.xlu0 %1174  ;;  %v1215_v4 = vpop.permute.xlu2 %1214 }
 0x252   : > { %v1161_v5 = vpop.permute.xlu1 %1160 }
 0x253   : > { %v1165_v6 = vadd.f32 %v1161_v5, %v1151_v59 }
 0x255   : > { %v1179_v7 = vadd.f32 %v1175_v15, %v1165_v6 }
 0x257   : > { %1490 = vrot.lane.b32.xlu2 %v1486_v10, %s1927_s12  ;;  %v1193_v20 = vadd.f32 %v1189_v58, %v1179_v7  ;;  %v1319_v58 = vmul.f32 %v1317_v38, %v2512_v43  ;;  %v1409_v10 = vstv %s1749_s5 }
 0x259   : > { %v1201_v9 = vpop.permute.xlu0 %1200  ;;  %v1239_v24 = vpop.permute.xlu2 %1238 }
 0x25a   : > { %v1187_v11 = vpop.permute.xlu1 %1186 }
 0x25b   : > { %v1192_v8 = vadd.f32 %v1187_v11, %v1178_v3  ;;  %v1410_v11 = vmul.f32 %v1409_v10, %v2549_v16 }
 0x25d   : > { %v1206_v12 = vadd.f32 %v1201_v9, %v1192_v8 }
 0x25f   : > { %v1220_v13 = vadd.f32 %v1215_v4, %v1206_v12 }
 0x261   : > { %v1217_v17 = vpop.permute.xlu0 %1216  ;;  %v1265_v21 = vpop.permute.xlu2 %1264  ;;  %v1228_v62 = vadd.f32 %v1226_v14, %v1220_v13 }
 0x262   : > { %v1203_v23 = vpop.permute.xlu1 %1202 }
 0x263   : > { %v1207_v18 = vadd.f32 %v1203_v23, %v1193_v20  ;;  %v1411_v20 = vmul.f32 %v1409_v10, %v2563_v31 }
 0x265   : > { %v1221_v36 = vadd.f32 %v1217_v17, %v1207_v18 }
 0x267   : > { %v1229_v26 = vadd.f32 %v1227_v25, %v1221_v36 }
 0x269   : > { %v1251_v27 = vpop.permute.xlu0 %1250  ;;  %v1281_v29 = vpop.permute.xlu2 %1280  ;;  %v1243_v40 = vadd.f32 %v1239_v24, %v1229_v26 }
 0x26a   : > { %v1237_v42 = vpop.permute.xlu1 %1236 }
 0x26b   : > { %v1242_v32 = vadd.f32 %v1237_v42, %v1228_v62 }
 0x26d   : > { %v1256_v35 = vadd.f32 %v1251_v27, %v1242_v32 }
 0x26f   : > { %v1270_v44 = vadd.f32 %v1265_v21, %v1256_v35 }
 0x271   : > { %v1267_v33 = vpop.permute.xlu0 %1266  ;;  %v1307_v30 = vpop.permute.xlu2 %1306 }
 0x272   : > { %v1253_v34 = vpop.permute.xlu1 %1252 }
 0x273   : > { %v1257_v37 = vadd.f32 %v1253_v34, %v1243_v40 }
 0x275   : > { %v1271_v47 = vadd.f32 %v1267_v33, %v1257_v37 }
 0x277   : > { %v1285_v54 = vadd.f32 %v1281_v29, %v1271_v47 }
 0x279   : > { %v1293_v39 = vpop.permute.xlu0 %1292  ;;  %v1331_v41 = vpop.permute.xlu2 %1330 }
 0x27a   : > { %v1279_v45 = vpop.permute.xlu1 %1278 }
 0x27b   : > { %v1284_v46 = vadd.f32 %v1279_v45, %v1270_v44 }
 0x27d   : > { %v1298_v19 = vadd.f32 %v1293_v39, %v1284_v46 }
 0x27f   : > { %v1312_v49 = vadd.f32 %v1307_v30, %v1298_v19 }
 0x281   : > { %v1309_v51 = vpop.permute.xlu0 %1308  ;;  %v1320_v53 = vadd.f32 %v1318_v50, %v1312_v49  ;;  %v1357_v55 = vpop.permute.xlu2 %1356 }
 0x282   : > { %v1295_v57 = vpop.permute.xlu1 %1294 }
 0x283   : > { %v1299_v52 = vadd.f32 %v1295_v57, %v1285_v54 }
 0x285   : > { %v1313_v48 = vadd.f32 %v1309_v51, %v1299_v52 }
 0x287   : > { %v1321_v59 = vadd.f32 %v1319_v58, %v1313_v48 }
 0x289   : > { %v1343_v60 = vpop.permute.xlu0 %1342  ;;  %v1373_v0 = vpop.permute.xlu2 %1372  ;;  %v1335_v28 = vadd.f32 %v1331_v41, %v1321_v59 }
 0x28a   : > { %v1329_v61 = vpop.permute.xlu1 %1328 }
 0x28b   : > { %v1334_v63 = vadd.f32 %v1329_v61, %v1320_v53 }
 0x28d   : > { %v1348_v22 = vadd.f32 %v1343_v60, %v1334_v63 }
 0x28f   : > { %v1362_v5 = vadd.f32 %v1357_v55, %v1348_v22 }
 0x291   : > { %v1359_v2 = vpop.permute.xlu0 %1358  ;;  %v1399_v3 = vpop.permute.xlu2 %1398 }
 0x292   : > { %v1345_v1 = vpop.permute.xlu1 %1344 }
 0x293   : > { %v1349_v15 = vadd.f32 %v1345_v1, %v1335_v28 }
 0x295   : > { %v1363_v9 = vadd.f32 %v1359_v2, %v1349_v15 }
 0x297   : > { %v1377_v12 = vadd.f32 %v1373_v0, %v1363_v9 }
 0x299   : > { %v1385_v4 = vpop.permute.xlu0 %1384  ;;  %v1423_v8 = vpop.permute.xlu2 %1422 }
 0x29a   : > { %v1371_v6 = vpop.permute.xlu1 %1370 }
 0x29b   : > { %v1376_v7 = vadd.f32 %v1371_v6, %v1362_v5 }
 0x29d   : > { %v1390_v24 = vadd.f32 %v1385_v4, %v1376_v7 }
 0x29f   : > { %v1404_v43 = vadd.f32 %v1399_v3, %v1390_v24 }
 0x2a1   : > { %v1401_v56 = vpop.permute.xlu0 %1400  ;;  %v1412_v13 = vadd.f32 %v1410_v11, %v1404_v43  ;;  %v1449_v18 = vpop.permute.xlu2 %1448 }
 0x2a2   : > { %v1387_v14 = vpop.permute.xlu1 %1386 }
 0x2a3   : > { %v1391_v17 = vadd.f32 %v1387_v14, %v1377_v12 }
 0x2a5   : > { %v1405_v21 = vadd.f32 %v1401_v56, %v1391_v17 }
 0x2a7   : > { %v1413_v62 = vadd.f32 %v1411_v20, %v1405_v21 }
 0x2a9   : > { %v1435_v23 = vpop.permute.xlu0 %1434  ;;  %v1465_v29 = vpop.permute.xlu2 %1464  ;;  %v1427_v32 = vadd.f32 %v1423_v8, %v1413_v62 }
 0x2aa   : > { %v1421_v36 = vpop.permute.xlu1 %1420 }
 0x2ab   : > { %v1426_v25 = vadd.f32 %v1421_v36, %v1412_v13 }
 0x2ad   : > { %v1440_v42 = vadd.f32 %v1435_v23, %v1426_v25 }
 0x2af   : > { %v1454_v33 = vadd.f32 %v1449_v18, %v1440_v42 }
 0x2b1   : > { %v1451_v26 = vpop.permute.xlu0 %1450  ;;  %v1491_v39 = vpop.permute.xlu2 %1490 }
 0x2b2   : > { %v1437_v27 = vpop.permute.xlu1 %1436 }
 0x2b3   : > { %v1441_v16 = vadd.f32 %v1437_v27, %v1427_v32 }
 0x2b5   : > { %v1455_v40 = vadd.f32 %v1451_v26, %v1441_v16 }
 0x2b7   : > { %v1469_v44 = vadd.f32 %v1465_v29, %v1455_v40 }
 0x2b9   : > { %v1477_v30 = vpop.permute.xlu0 %1476 }
 0x2ba   : > { %v1463_v34 = vpop.permute.xlu1 %1462 }
 0x2bb   : > { %v1468_v35 = vadd.f32 %v1463_v34, %v1454_v33 }
 0x2bd   : > { %v1482_v37 = vadd.f32 %v1477_v30, %v1468_v35 }
 0x2bf   : > { %v1496_v41 = vadd.f32 %v1491_v39, %v1482_v37 }
 0x2c1   : > { %v1498_v31 = vsub.f32 0.0, %v1496_v41  ;;  %v1493_v47 = vpop.permute.xlu0 %1492 }
 0x2c2   : > { %v1479_v45 = vpop.permute.xlu1 %1478 }
 0x2c3   : > { %v1500_v46 = vmul.f32 1.442695, %v1498_v31  ;;  %v1483_v38 = vadd.f32 %v1479_v45, %v1469_v44 }
 0x2c5   : > { %1836 = vpow2.f32 %v1500_v46  ;;  %v1497_v19 = vadd.f32 %v1493_v47, %v1483_v38 }
 0x2c7   : > { %v1499_v49 = vsub.f32 0.0, %v1497_v19 }
 0x2c9   : > { %v1502_v50 = vmul.f32 1.442695, %v1499_v49 }
 0x2cb   : > { %v1837_v51 = vpop.eup %1836  ;;  %1838 = vpow2.f32 %v1502_v50 }
 0x2cc   : > { %v1504_v54 = vadd.f32 1.0, %v1837_v51 }
 0x2ce   : > { %1840 = vrcp.f32 %v1504_v54  ;;  %v1517_v58 = vand.u32 2147483648, %v1504_v54  ;;  %v1515_v60 = vand.u32 2147483647, %v1504_v54  ;;  %vm1511_vm4 = vweird.f32 %v1504_v54 }
 0x2d0   : > { %v1518_v2 = vor.u32 1.1754944e-38, %v1517_v58  ;;  %vm1516_vm6 = vcmp.eq.f32.partialorder %v1515_v60, 8.507059e+37 }
 0x2d1   : > { %v1839_v53 = vpop.eup %1838 }
 0x2d2   : > { %v1505_v55 = vadd.f32 1.0, %v1839_v53 }
 0x2d4   : > { %v1841_v57 = vpop.eup %1840  ;;  %1842 = vrcp.f32 %v1505_v55  ;;  %v1532_v28 = vand.u32 2147483648, %v1505_v55  ;;  %v1530_v4 = vand.u32 2147483647, %v1505_v55  ;;  %vm1526_vm8 = vweird.f32 %v1505_v55 }
 0x2d5   : > { %v1507_v52 = vmul.f32 %v1841_v57, %v1504_v54  ;;  %vm1512_vm3 = vweird.f32 %v1841_v57 }
 0x2d6   : > { %vm1513_vm5 = vmor %vm1511_vm4, %vm1512_vm3  ;;  %v1533_v6 = vor.u32 1.1754944e-38, %v1532_v28  ;;  %vm1531_vm10 = vcmp.eq.f32.partialorder %v1530_v4, 8.507059e+37 }
 0x2d7   : > { %v1508_v48 = vsub.f32 1.0, %v1507_v52 }
 0x2d9   : > { %v1509_v59 = vmul.f32 %v1841_v57, %v1508_v48 }
 0x2da   : > { %v1843_v61 = vpop.eup %1842 }
 0x2db   : > { %v1510_v0 = vadd.f32 %v1841_v57, %v1509_v59  ;;  %v1522_v63 = vmul.f32 %v1843_v61, %v1505_v55  ;;  %vm1527_vm7 = vweird.f32 %v1843_v61 }
 0x2dc   : > { %vm1528_vm9 = vmor %vm1526_vm8, %vm1527_vm7 }
 0x2dd   : > { %v1514_v1 = vsel %vm1513_vm5, %v1841_v57, %v1510_v0  ;;  %v1523_v22 = vsub.f32 1.0, %v1522_v63 }
 0x2de   : > { %v1519_v3 = vsel %vm1516_vm6, %v1518_v2, %v1514_v1 }
 0x2df   : > { %v1524_v15 = vmul.f32 %v1843_v61, %v1523_v22 }
 0x2e1   : > { %v1525_v5 = vadd.f32 %v1843_v61, %v1524_v15 }
 0x2e3   : > { %v1529_v7 = vsel %vm1528_vm9, %v1843_v61, %v1525_v5 }
 0x2e4   : > { %v1534_v10 = vsel %vm1531_vm10, %v1533_v6, %v1529_v7 }
 0x2e5 LB: >> { %s1756_s8 = sshll.u32 %s1917_s7, 4  ;;  %vm1549_vm11 = vcmask 130048   ;;  %s1541_s7 = sadd.s32 1, %s1917_s7   ;;  %s1917_s7 = sphi %s1915_s7, %s1541_s7  }
 0x2e6   : >> { %s1543_s12 = scalar_lea.vmem %s1957_s18, %s1756_s8  ;;  %s1548_s26 = scalar_lea.vmem %s1962_s21, %s1756_s8 }
 0x2e7   : >> { %v1544_v9 = vld [vmem:[%s1543_s12] sm:$0xff]  ;;  %v1545_v24 = vld [vmem:[%s1543_s12 + $0x8] sm:$0xff]  ;;  %p1538_p8 = scmp.ge.s32.totalorder %s1541_s7, 64  }
 0x2e8   : >> { %v1546_v43 = vmul.f32 %v1544_v9, %v1519_v3  ;;  %v1547_v11 = vmul.f32 %v1545_v24, %v1534_v10 }
 0x2e9   : > { %1540 = sbr.rel (!%p1538_p8) target bundleno = 741 (0x2e5), region = 92 }
 0x2ea   : >> { %1550 = vst.msk [vmem:[%s1548_s26] sm:$0xff] %vm1549_vm11, %v1546_v43 }
 0x2eb   : >> { %1551 = vst.msk [vmem:[%s1548_s26 + $0x8] sm:$0xff] %vm1549_vm11, %v1547_v11 }
 0x2ee PF: > { %s13_s9 = sadd.s32 1, %s1893_s9  }
 0x2ef   : > { %p10_p9 = scmp.ge.s32.totalorder %s13_s9, 4  }
 0x2f1   :  { %12 = sbr.rel (!%p10_p9) target bundleno = 1 (0x1), region = 103 }
 0x2f6   :  { %1573 = vsyncpa [#allocation4], 1 }
 0x2f7   :  { %1575 = vsyncpa [#allocation4 + $0x1], 1 }

</bundles_post_ra>
